<compile_context>
chip_gen: v5e
topology: v5e:2x2
jax: 0.10.0
libtpu: 0.0.40
codegen_flags: <defaults>
</compile_context>

<pallas_src>
import functools
import math

import jax
import jax.numpy as jnp
from jax.experimental import pallas as pl
from jax.experimental.pallas import tpu as pltpu


# -----------------------------------------------------------------------------
# Small helpers
# -----------------------------------------------------------------------------
def _round_up(x, m):
    return ((x + m - 1) // m) * m


def _nbytes(shape, dtype):
    return math.prod(shape) * jnp.dtype(dtype).itemsize


def _vmem_limit(block_bytes, scratch_bytes=0):
    # Double-buffered pipeline blocks + in-kernel f32 temporaries + margin,
    # instead of a blanket cap (keeps headroom on v7x's 64 MiB per-core VMEM).
    return int(max(16 * 1024 * 1024,
                   2 * block_bytes + scratch_bytes + 8 * 1024 * 1024))


def _lane_pack(width):
    """Grid points packed into one 128-lane row.

    Falls back to 1 (lane-sparse blocks, much slower) when `width` does not
    divide 128."""
    if width <= 128 and 128 % width == 0:
        return 128 // width
    return 1


def _default_max_tile_rows():
    # v5e/v6e (128 MiB VMEM): larger row tiles amortize per-grid-step overhead.
    # v7x (64 MiB VMEM, 2 TensorCores): keep row tiles <= 2048.
    try:
        vmem = getattr(pltpu.get_tpu_info(), "vmem_capacity_bytes",
                       64 * 1024 * 1024)
    except Exception:
        vmem = 64 * 1024 * 1024
    return 4096 if vmem >= 96 * 1024 * 1024 else 2048


def _row_tiling(rows, max_tile, min_grid=4, align=16):
    """Pick (tile, rows_padded).

    Prefers an exact divisor of `rows` (no padding => no per-layer pad/slice
    glue) with >= min_grid steps so v7x's two TensorCores each get >= 2
    pipelined grid steps."""
    rows_a = _round_up(rows, align)
    max_tile = max(align, min(max_tile, rows_a))
    if rows % align == 0:
        for g in range(min_grid, min(rows // align, 1024) + 1):
            if rows % g == 0:
                t = rows // g
                if t % align == 0 and t <= max_tile:
                    return t, rows
    g = max(min_grid, -(-rows_a // max_tile))
    tile = _round_up(-(-rows_a // g), align)
    return tile, _round_up(rows_a, tile)


# -----------------------------------------------------------------------------
# Pallas kernels
# -----------------------------------------------------------------------------
def _affine_kernel(x_ref, w_ref, b_ref, o_ref, *, relu):
    # o = act(x @ w + b)     (lane-dense block-diagonal weights)
    y = jnp.dot(x_ref[...], w_ref[...], preferred_element_type=jnp.float32)
    y = y + b_ref[...]
    if relu:
        y = jnp.maximum(y, 0.0)
    o_ref[...] = y.astype(o_ref.dtype)


def _fuse_kernel(spec_ref, x_ref, w_ref, b_ref, o_ref, *, relu):
    # o = act(spectral_branch + x @ w + b)   (Conv1d 1x1 == channel matmul)
    # x/w are bf16 MXU operands; bias + residual + relu stay f32 on the VPU.
    y = jnp.dot(x_ref[...], w_ref[...], preferred_element_type=jnp.float32)
    y = y + b_ref[...] + spec_ref[...]
    if relu:
        y = jnp.maximum(y, 0.0)
    o_ref[...] = y.astype(o_ref.dtype)


def _head_kernel(x_ref, w1_ref, b1_ref, w2_ref, b2_ref, o_ref):
    # o = relu(x @ w1 + b1) @ w2 + b2 -- fc1+fc2 fused; the (tile, pack*128)
    # intermediate never leaves VMEM.
    y = jnp.dot(x_ref[...], w1_ref[...], preferred_element_type=jnp.float32)
    y = jnp.maximum(y + b1_ref[...], 0.0)
    z = jnp.dot(y.astype(w2_ref.dtype), w2_ref[...],
                preferred_element_type=jnp.float32)
    o_ref[...] = (z + b2_ref[...]).astype(o_ref.dtype)


def _spectral_kernel(xs_ref, ws_ref, o_ref):
    # Batched (over 2 * modes1 * modes2 retained modes) real-packed complex
    # matmul:  [xr xi] @ [[wr, wi], [-wi, wr]] = [Re(out), Im(out)]
    o_ref[...] = jnp.einsum(
        "mbk,mkn->mbn", xs_ref[...], ws_ref[...],
        preferred_element_type=jnp.float32).astype(o_ref.dtype)


# -----------------------------------------------------------------------------
# Pallas wrappers
# -----------------------------------------------------------------------------
def pallas_affine(x, w, b, *, relu, tile_rows, out_dtype):
    """x: (R, K), w: (K, L), b: (1, L) -> act(x @ w + b): (R, L)."""
    R, K = x.shape
    L = w.shape[1]
    assert R % tile_rows == 0
    blocks = (_nbytes((tile_rows, K), x.dtype) + _nbytes((K, L), w.dtype)
              + _nbytes((1, L), b.dtype) + _nbytes((tile_rows, L), out_dtype))
    return pl.pallas_call(
        functools.partial(_affine_kernel, relu=relu),
        out_shape=jax.ShapeDtypeStruct((R, L), out_dtype),
        grid=(R // tile_rows,),
        in_specs=[
            pl.BlockSpec((tile_rows, K), lambda i: (i, 0)),
            pl.BlockSpec((K, L), lambda i: (0, 0)),
            pl.BlockSpec((1, L), lambda i: (0, 0)),
        ],
        out_specs=pl.BlockSpec((tile_rows, L), lambda i: (i, 0)),
        compiler_params=pltpu.CompilerParams(
            dimension_semantics=("parallel",),
            vmem_limit_bytes=_vmem_limit(blocks, 2 * tile_rows * L * 4)),
    )(x, w, b)


def pallas_fuse(spec, x, w, b, *, relu, tile_rows, out_dtype):
    """spec: (R, L) f32, x: (R, L) bf16, w: (L, L), b: (1, L)."""
    R, L = x.shape
    assert R % tile_rows == 0
    blocks = (_nbytes((tile_rows, L), spec.dtype)
              + _nbytes((tile_rows, L), x.dtype) + _nbytes((L, L), w.dtype)
              + _nbytes((1, L), b.dtype) + _nbytes((tile_rows, L), out_dtype))
    return pl.pallas_call(
        functools.partial(_fuse_kernel, relu=relu),
        out_shape=jax.ShapeDtypeStruct((R, L), out_dtype),
        grid=(R // tile_rows,),
        in_specs=[
            pl.BlockSpec((tile_rows, L), lambda i: (i, 0)),
            pl.BlockSpec((tile_rows, L), lambda i: (i, 0)),
            pl.BlockSpec((L, L), lambda i: (0, 0)),
            pl.BlockSpec((1, L), lambda i: (0, 0)),
        ],
        out_specs=pl.BlockSpec((tile_rows, L), lambda i: (i, 0)),
        compiler_params=pltpu.CompilerParams(
            dimension_semantics=("parallel",),
            vmem_limit_bytes=_vmem_limit(blocks, 2 * tile_rows * L * 4)),
    )(spec, x, w, b)


def pallas_head(x, w1, b1, w2, b2, *, tile_rows):
    """Fused fc1(relu) + fc2: x (R, L) bf16 -> (R, Co) f32."""
    R, L = x.shape
    Hd = w1.shape[1]
    Co = w2.shape[1]
    assert R % tile_rows == 0
    blocks = (_nbytes((tile_rows, L), x.dtype) + _nbytes((L, Hd), w1.dtype)
              + _nbytes((1, Hd), b1.dtype) + _nbytes((Hd, Co), w2.dtype)
              + _nbytes((1, Co), b2.dtype)
              + _nbytes((tile_rows, Co), jnp.float32))
    return pl.pallas_call(
        _head_kernel,
        out_shape=jax.ShapeDtypeStruct((R, Co), jnp.float32),
        grid=(R // tile_rows,),
        in_specs=[
            pl.BlockSpec((tile_rows, L), lambda i: (i, 0)),
            pl.BlockSpec((L, Hd), lambda i: (0, 0)),
            pl.BlockSpec((1, Hd), lambda i: (0, 0)),
            pl.BlockSpec((Hd, Co), lambda i: (0, 0)),
            pl.BlockSpec((1, Co), lambda i: (0, 0)),
        ],
        out_specs=pl.BlockSpec((tile_rows, Co), lambda i: (i, 0)),
        compiler_params=pltpu.CompilerParams(
            dimension_semantics=("parallel",),
            vmem_limit_bytes=_vmem_limit(blocks, 3 * tile_rows * Hd * 4)),
    )(x, w1, b1, w2, b2)


def _spectral_mix_pallas(xs, ws):
    """xs: (M, Bp, 2Cin) f32, ws: (M, 2Cin, 2Cout) f32 -> (M, Bp, 2Cout)."""
    M, Bp, K = xs.shape
    N = ws.shape[2]
    blocks = (_nbytes(xs.shape, xs.dtype) + _nbytes(ws.shape, ws.dtype)
              + _nbytes((M, Bp, N), jnp.float32))
    return pl.pallas_call(
        _spectral_kernel,
        out_shape=jax.ShapeDtypeStruct((M, Bp, N), jnp.float32),
        grid=(1,),
        in_specs=[
            pl.BlockSpec((M, Bp, K), lambda i: (0, 0, 0)),
            pl.BlockSpec((M, K, N), lambda i: (0, 0, 0)),
        ],
        out_specs=pl.BlockSpec((M, Bp, N), lambda i: (0, 0, 0)),
        compiler_params=pltpu.CompilerParams(
            vmem_limit_bytes=_vmem_limit(blocks)),
    )(xs, ws)


# -----------------------------------------------------------------------------
# Spectral conv (channels-last; FFTs in plain JAX glue)
# -----------------------------------------------------------------------------
def spectral_conv2d_nhwc(h, w1, w2, ws_packed, modes1, modes2):
    """h: (B, H, W, Cin) f32; w1,w2: (Cin,Cout,m1,m2) c64; ws_packed: real.

    Returns (B, H, W, Cout) f32, channels-last (no NCHW transposes)."""
    B, H, W, Cin = h.shape
    Cout = w1.shape[1]
    Wf = W // 2 + 1
    Mg = modes1 * modes2

    x_ft = jnp.fft.rfft2(h, axes=(1, 2))                  # (B, H, Wf, Cin)
    low = x_ft[:, :modes1, :modes2, :]                    # (B, m1, m2, Cin)
    high = x_ft[:, H - modes1:, :modes2, :]

    if B >= 8:
        # Merged 2*Mg mode batch, B padded to a multiple of 8 sublanes.
        modes = jnp.stack([low, high], axis=0)            # (2, B, m1, m2, Cin)
        xs = jnp.concatenate([jnp.real(modes), jnp.imag(modes)], axis=-1)
        xs = jnp.transpose(xs, (0, 2, 3, 1, 4)).reshape(2 * Mg, B, 2 * Cin)
        Bp = _round_up(B, 8)
        if Bp != B:
            xs = jnp.pad(xs, ((0, 0), (0, Bp - B), (0, 0)))
        out = _spectral_mix_pallas(xs.astype(jnp.float32), ws_packed)
        out = out[:, :B, :]                                # (2Mg, B, 2Cout)
        out_c = (out[..., :Cout] + 1j * out[..., Cout:]).astype(jnp.complex64)
        out_c = jnp.transpose(out_c.reshape(2, modes1, modes2, B, Cout),
                              (0, 3, 1, 2, 4))             # (2, B, m1, m2, C)
        out_low, out_high = out_c[0], out_c[1]
    else:
        # Small-batch fallback (perf review): the Pallas call's fixed cost
        # exceeds the useful work here, so let XLA do the tiny complex einsum.
        out_low = jnp.einsum("bxyi,ioxy->bxyo", low, w1)
        out_high = jnp.einsum("bxyi,ioxy->bxyo", high, w2)

    if H >= 2 * modes1:
        mid = jnp.zeros((B, H - 2 * modes1, modes2, Cout), jnp.complex64)
        rows = jnp.concatenate([out_low, mid, out_high], axis=1)  # (B,H,m2,C)
        out_ft = jnp.pad(rows, ((0, 0), (0, 0), (0, Wf - modes2), (0, 0)))
    else:  # degenerate overlap case: match the PyTorch scatter/overwrite order
        out_ft = jnp.zeros((B, H, Wf, Cout), jnp.complex64)
        out_ft = out_ft.at[:, :modes1, :modes2, :].set(out_low)
        out_ft = out_ft.at[:, H - modes1:, :modes2, :].set(out_high)
    return jnp.fft.irfft2(out_ft, s=(H, W), axes=(1, 2))  # (B, H, W, Cout) f32


# -----------------------------------------------------------------------------
# One-time parameter packing (hoisted out of the jitted forward)
# -----------------------------------------------------------------------------
def _pack_spectral_weights(w1, w2, modes1, modes2):
    Cin, Cout = w1.shape[0], w1.shape[1]
    Mg = modes1 * modes2

    def pack(w):  # (Cin, Cout, m1, m2) complex -> (Mg, 2Cin, 2Cout) real
        wr = jnp.transpose(jnp.real(w), (2, 3, 0, 1)).reshape(Mg, Cin, Cout)
        wi = jnp.transpose(jnp.imag(w), (2, 3, 0, 1)).reshape(Mg, Cin, Cout)
        top = jnp.concatenate([wr, wi], axis=-1)
        bot = jnp.concatenate([-wi, wr], axis=-1)
        return jnp.concatenate([top, bot], axis=1)

    return jnp.concatenate([pack(w1), pack(w2)], axis=0).astype(jnp.float32)


def prepack_params(params, *, width, modes1, modes2):
    """Pack weights into the lane-dense block-diagonal layout once."""
    pack = _lane_pack(width)
    eye = jnp.eye(pack, dtype=jnp.float32)

    def bd(w, dtype):
        return jnp.kron(eye, w.astype(jnp.float32)).astype(dtype)

    def tb(b):
        return jnp.tile(b.astype(jnp.float32), pack).reshape(1, -1)

    pp = {
        "fc0_w": bd(params["fc0_w"], jnp.float32),   # tiny K=pack*Cin; stays f32
        "fc0_b": tb(params["fc0_b"]),
        "fc1_w": bd(params["fc1_w"], jnp.bfloat16),
        "fc1_b": tb(params["fc1_b"]),
        "fc2_w": bd(params["fc2_w"], jnp.bfloat16),
        "fc2_b": tb(params["fc2_b"]),
    }
    for l in range(4):
        pp[f"w{l}_w"] = bd(params[f"w{l}_w"], jnp.bfloat16)
        pp[f"w{l}_b"] = tb(params[f"w{l}_b"])
        pp[f"conv{l}_w1"] = params[f"conv{l}_w1"]
        pp[f"conv{l}_w2"] = params[f"conv{l}_w2"]
        pp[f"conv{l}_ws"] = _pack_spectral_weights(
            params[f"conv{l}_w1"], params[f"conv{l}_w2"], modes1, modes2)
    return jax.tree_util.tree_map(jnp.asarray, pp)


# -----------------------------------------------------------------------------
# FNO2d forward (Pallas) and pure-JAX reference
# -----------------------------------------------------------------------------
def fno2d_forward(x, pp, *, modes1, modes2, width, max_tile_rows=None):
    B, H, W, Cin = x.shape
    N = B * H * W
    pack = _lane_pack(width)          # grid points packed per 128-lane row
    lanes = pack * width              # == 128 when width divides 128
    if max_tile_rows is None:
        max_tile_rows = _default_max_tile_rows()

    R = -(-N // pack)                 # dense rows needed
    tile_r, R_pad = _row_tiling(R, max_tile_rows)
    # Keep the head's in-kernel (tile, pack*128) f32 intermediate bounded.
    head_tile = tile_r // 2 if (tile_r > 2048 and tile_r % 32 == 0) else tile_r
    N_pad = R_pad * pack

    # ---- fc0 lift: (N, Cin) -> (N, width), lane-dense, bf16 output ----
    x_flat = x.reshape(N, Cin).astype(jnp.float32)
    if N_pad != N:
        x_flat = jnp.pad(x_flat, ((0, N_pad - N), (0, 0)))
    x_dense = x_flat.reshape(R_pad, pack * Cin)
    h = pallas_affine(x_dense, pp["fc0_w"], pp["fc0_b"], relu=False,
                      tile_rows=tile_r, out_dtype=jnp.bfloat16)

    # ---- 4 Fourier layers: h = act(K(h) + W(h)) ----
    for l in range(4):
        h_pts = h.reshape(N_pad, width)
        if N_pad != N:                         # avoided when tiling is exact
            h_pts = h_pts[:N]
        spec = spectral_conv2d_nhwc(
            h_pts.reshape(B, H, W, width).astype(jnp.float32),
            pp[f"conv{l}_w1"], pp[f"conv{l}_w2"], pp[f"conv{l}_ws"],
            modes1, modes2)
        spec_flat = spec.reshape(N, width)
        if N_pad != N:
            spec_flat = jnp.pad(spec_flat, ((0, N_pad - N), (0, 0)))
        spec_dense = spec_flat.reshape(R_pad, lanes)        # stays f32
        h = pallas_fuse(spec_dense, h, pp[f"w{l}_w"], pp[f"w{l}_b"],
                        relu=(l != 3), tile_rows=tile_r,
                        out_dtype=jnp.bfloat16)

    # ---- projection head: fused fc1(relu) + fc2, f32 output ----
    out_dense = pallas_head(h, pp["fc1_w"], pp["fc1_b"],
                            pp["fc2_w"], pp["fc2_b"], tile_rows=head_tile)
    out = out_dense.reshape(N_pad)
    if N_pad != N:
        out = out[:N]
    return out.reshape(B, H, W, 1)


def fno2d_reference(x, params, *, modes1, modes2, width):
    B, H, W, _ = x.shape
    h = x @ params["fc0_w"] + params["fc0_b"]
    for l in range(4):
        hb = jnp.transpose(h, (0, 3, 1, 2))
        x_ft = jnp.fft.rfft2(hb)
        out_ft = jnp.zeros((B, width, H, W // 2 + 1), jnp.complex64)
        out_ft = out_ft.at[:, :, :modes1, :modes2].set(
            jnp.einsum("bixy,ioxy->boxy", x_ft[:, :, :modes1, :modes2],
                       params[f"conv{l}_w1"]))
        out_ft = out_ft.at[:, :, H - modes1:, :modes2].set(
            jnp.einsum("bixy,ioxy->boxy", x_ft[:, :, H - modes1:, :modes2],
                       params[f"conv{l}_w2"]))
        spec = jnp.transpose(jnp.fft.irfft2(out_ft, s=(H, W)), (0, 2, 3, 1))
        h = spec + h @ params[f"w{l}_w"] + params[f"w{l}_b"]
        if l != 3:
            h = jnp.maximum(h, 0.0)
    h = jnp.maximum(h @ params["fc1_w"] + params["fc1_b"], 0.0)
    h = h @ params["fc2_w"] + params["fc2_b"]
    return h


# -----------------------------------------------------------------------------
# Deterministic parameter initialization
# -----------------------------------------------------------------------------
def init_params(key, *, in_channels, width, modes1, modes2):
    params = {}
    keys = jax.random.split(key, 32)
    k = iter(keys)

    def lin(key_w, key_b, cin, cout):
        w = jax.random.uniform(key_w, (cin, cout), jnp.float32, -0.1, 0.1)
        b = jax.random.uniform(key_b, (cout,), jnp.float32, -0.1, 0.1)
        return w, b

    params["fc0_w"], params["fc0_b"] = lin(next(k), next(k), in_channels, width)
    params["fc1_w"], params["fc1_b"] = lin(next(k), next(k), width, 128)
    params["fc2_w"], params["fc2_b"] = lin(next(k), next(k), 128, 1)

    scale = 1.0 / (width * width)
    for l in range(4):
        kr1, ki1, kr2, ki2 = next(k), next(k), next(k), next(k)
        shape = (width, width, modes1, modes2)
        params[f"conv{l}_w1"] = (scale * (
            jax.random.uniform(kr1, shape, jnp.float32)
            + 1j * jax.random.uniform(ki1, shape, jnp.float32))).astype(jnp.complex64)
        params[f"conv{l}_w2"] = (scale * (
            jax.random.uniform(kr2, shape, jnp.float32)
            + 1j * jax.random.uniform(ki2, shape, jnp.float32))).astype(jnp.complex64)
        # Conv1d(width, width, 1) == channel matmul; store weight as (in, out).
        params[f"w{l}_w"], params[f"w{l}_b"] = lin(next(k), next(k), width, width)
    return params


# -----------------------------------------------------------------------------
if __name__ == "__main__":
    B, S, IN_C = 2, 16, 3
    MODES1, MODES2, WIDTH = 4, 4, 32

    key = jax.random.PRNGKey(0)
    k_x, k_p = jax.random.split(key)
    x = jax.random.normal(k_x, (B, S, S, IN_C), jnp.float32)
    params = init_params(k_p, in_channels=IN_C, width=WIDTH,
                         modes1=MODES1, modes2=MODES2)

    # One-time weight packing, hoisted out of the jitted forward.
    packed = prepack_params(params, width=WIDTH, modes1=MODES1, modes2=MODES2)

    fwd = jax.jit(functools.partial(fno2d_forward, modes1=MODES1,
                                    modes2=MODES2, width=WIDTH))
    out = fwd(x, packed)
    jax.block_until_ready(out)

    ref = fno2d_reference(x, params, modes1=MODES1, modes2=MODES2, width=WIDTH)
    assert out.shape == (B, S, S, 1)
    # bf16 MXU operands + bf16 inter-layer activations (per the perf review)
    # make a strict 1e-4 f32 check inapplicable; 2e-2 bounds the bf16
    # quantization error with ample margin at these magnitudes.
    err = float(jnp.max(jnp.abs(out - ref)))
    assert jnp.allclose(out, ref, rtol=2e-2, atol=2e-2), err
    print("KERNEL_OK")
</pallas_src>

<mosaic_0001>
module attributes {stable_mosaic.version = 11 : i64} {
  func.func @_affine_kernel(%arg0: i32, %arg1: memref<32x12xf32, #tpu.memory_space<vmem>>, %arg2: memref<12x128xf32, #tpu.memory_space<vmem>>, %arg3: memref<1x128xf32, #tpu.memory_space<vmem>>, %arg4: memref<32x128xbf16, #tpu.memory_space<vmem>>) attributes {dimension_semantics = [#tpu.dimension_semantics<parallel>], iteration_bounds = array<i64: 4>, scalar_prefetch = 0 : i64, scratch_operands = 0 : i64, tpu.core_type = #tpu.core_type<tc>, window_params = [{transform_indices = @transform_0, window_bounds = array<i64: 32, 12>}, {pipeline_mode = #tpu.pipeline_mode<synchronous>, transform_indices = @transform_1, window_bounds = array<i64: 12, 128>}, {pipeline_mode = #tpu.pipeline_mode<synchronous>, transform_indices = @transform_2, window_bounds = array<i64: 1, 128>}, {transform_indices = @transform_3, window_bounds = array<i64: 32, 128>}]} {
    %c0 = arith.constant 0 : index
    %c0_0 = arith.constant 0 : index
    %0 = vector.load %arg1[%c0, %c0_0] : memref<32x12xf32, #tpu.memory_space<vmem>>, vector<32x12xf32>
    %c0_1 = arith.constant 0 : index
    %c0_2 = arith.constant 0 : index
    %1 = vector.load %arg2[%c0_1, %c0_2] : memref<12x128xf32, #tpu.memory_space<vmem>>, vector<12x128xf32>
    %cst = arith.constant dense<0.000000e+00> : vector<32x128xf32>
    %2 = tpu.matmul %0, %1, %cst {dimension_numbers = #tpu.dot_dimension_numbers<[1], [0], [0], [1], [0, 0, 1, 1], [], []>} : vector<32x12xf32>, vector<12x128xf32>, vector<32x128xf32> -> vector<32x128xf32>
    %c0_3 = arith.constant 0 : index
    %c0_4 = arith.constant 0 : index
    %3 = vector.load %arg3[%c0_3, %c0_4] : memref<1x128xf32, #tpu.memory_space<vmem>>, vector<1x128xf32>
    %4 = vector.broadcast %3 : vector<1x128xf32> to vector<32x128xf32>
    %5 = arith.addf %2, %4 : vector<32x128xf32>
    %6 = arith.truncf %5 : vector<32x128xf32> to vector<32x128xbf16>
    %c0_5 = arith.constant 0 : index
    %c0_6 = arith.constant 0 : index
    %7 = vector.load %arg4[%c0_5, %c0_6] : memref<32x128xbf16, #tpu.memory_space<vmem>>, vector<32x128xbf16>
    tpu.vector_store %arg4[%c0_5, %c0_6], %6 {strides = array<i32>} : memref<32x128xbf16, #tpu.memory_space<vmem>>, vector<32x128xbf16>,
    return
  }
  func.func @transform_0(%arg0: i32) -> (i32, i32) {
    %c0_i32 = arith.constant 0 : i32
    %c0_i32_0 = arith.constant 0 : i32
    return %arg0, %c0_i32 : i32, i32
  }
  func.func @transform_1(%arg0: i32) -> (i32, i32) {
    %c0_i32 = arith.constant 0 : i32
    %c0_i32_0 = arith.constant 0 : i32
    %c0_i32_1 = arith.constant 0 : i32
    return %c0_i32, %c0_i32_0 : i32, i32
  }
  func.func @transform_2(%arg0: i32) -> (i32, i32) {
    %c0_i32 = arith.constant 0 : i32
    %c0_i32_0 = arith.constant 0 : i32
    %c0_i32_1 = arith.constant 0 : i32
    return %c0_i32, %c0_i32_0 : i32, i32
  }
  func.func @transform_3(%arg0: i32) -> (i32, i32) {
    %c0_i32 = arith.constant 0 : i32
    %c0_i32_0 = arith.constant 0 : i32
    return %arg0, %c0_i32 : i32, i32
  }
}

module attributes {stable_mosaic.version = 11 : i64} {
  func.func @_fuse_kernel(%arg0: i32, %arg1: memref<32x128xf32, #tpu.memory_space<vmem>>, %arg2: memref<32x128xbf16, #tpu.memory_space<vmem>>, %arg3: memref<128x128xbf16, #tpu.memory_space<vmem>>, %arg4: memref<1x128xf32, #tpu.memory_space<vmem>>, %arg5: memref<32x128xbf16, #tpu.memory_space<vmem>>) attributes {dimension_semantics = [#tpu.dimension_semantics<parallel>], iteration_bounds = array<i64: 4>, scalar_prefetch = 0 : i64, scratch_operands = 0 : i64, tpu.core_type = #tpu.core_type<tc>, window_params = [{transform_indices = @transform_0, window_bounds = array<i64: 32, 128>}, {transform_indices = @transform_1, window_bounds = array<i64: 32, 128>}, {pipeline_mode = #tpu.pipeline_mode<synchronous>, transform_indices = @transform_2, window_bounds = array<i64: 128, 128>}, {pipeline_mode = #tpu.pipeline_mode<synchronous>, transform_indices = @transform_3, window_bounds = array<i64: 1, 128>}, {transform_indices = @transform_4, window_bounds = array<i64: 32, 128>}]} {
    %c0 = arith.constant 0 : index
    %c0_0 = arith.constant 0 : index
    %0 = vector.load %arg2[%c0, %c0_0] : memref<32x128xbf16, #tpu.memory_space<vmem>>, vector<32x128xbf16>
    %c0_1 = arith.constant 0 : index
    %c0_2 = arith.constant 0 : index
    %1 = vector.load %arg3[%c0_1, %c0_2] : memref<128x128xbf16, #tpu.memory_space<vmem>>, vector<128x128xbf16>
    %cst = arith.constant dense<0.000000e+00> : vector<32x128xf32>
    %2 = tpu.matmul %0, %1, %cst {dimension_numbers = #tpu.dot_dimension_numbers<[1], [0], [0], [1], [0, 0, 1, 1], [], []>} : vector<32x128xbf16>, vector<128x128xbf16>, vector<32x128xf32> -> vector<32x128xf32>
    %c0_3 = arith.constant 0 : index
    %c0_4 = arith.constant 0 : index
    %3 = vector.load %arg4[%c0_3, %c0_4] : memref<1x128xf32, #tpu.memory_space<vmem>>, vector<1x128xf32>
    %4 = vector.broadcast %3 : vector<1x128xf32> to vector<32x128xf32>
    %5 = arith.addf %2, %4 : vector<32x128xf32>
    %c0_5 = arith.constant 0 : index
    %c0_6 = arith.constant 0 : index
    %6 = vector.load %arg1[%c0_5, %c0_6] : memref<32x128xf32, #tpu.memory_space<vmem>>, vector<32x128xf32>
    %7 = arith.addf %5, %6 : vector<32x128xf32>
    %cst_7 = arith.constant 0.000000e+00 : f32
    %8 = vector.broadcast %cst_7 : f32 to vector<32x128xf32>
    %9 = arith.maximumf %7, %8 : vector<32x128xf32>
    %10 = arith.truncf %9 : vector<32x128xf32> to vector<32x128xbf16>
    %c0_8 = arith.constant 0 : index
    %c0_9 = arith.constant 0 : index
    %11 = vector.load %arg5[%c0_8, %c0_9] : memref<32x128xbf16, #tpu.memory_space<vmem>>, vector<32x128xbf16>
    tpu.vector_store %arg5[%c0_8, %c0_9], %10 {strides = array<i32>} : memref<32x128xbf16, #tpu.memory_space<vmem>>, vector<32x128xbf16>,
    return
  }
  func.func @transform_0(%arg0: i32) -> (i32, i32) {
    %c0_i32 = arith.constant 0 : i32
    %c0_i32_0 = arith.constant 0 : i32
    return %arg0, %c0_i32 : i32, i32
  }
  func.func @transform_1(%arg0: i32) -> (i32, i32) {
    %c0_i32 = arith.constant 0 : i32
    %c0_i32_0 = arith.constant 0 : i32
    return %arg0, %c0_i32 : i32, i32
  }
  func.func @transform_2(%arg0: i32) -> (i32, i32) {
    %c0_i32 = arith.constant 0 : i32
    %c0_i32_0 = arith.constant 0 : i32
    %c0_i32_1 = arith.constant 0 : i32
    return %c0_i32, %c0_i32_0 : i32, i32
  }
  func.func @transform_3(%arg0: i32) -> (i32, i32) {
    %c0_i32 = arith.constant 0 : i32
    %c0_i32_0 = arith.constant 0 : i32
    %c0_i32_1 = arith.constant 0 : i32
    return %c0_i32, %c0_i32_0 : i32, i32
  }
  func.func @transform_4(%arg0: i32) -> (i32, i32) {
    %c0_i32 = arith.constant 0 : i32
    %c0_i32_0 = arith.constant 0 : i32
    return %arg0, %c0_i32 : i32, i32
  }
}

module attributes {stable_mosaic.version = 11 : i64} {
  func.func @_head_kernel(%arg0: i32, %arg1: memref<32x128xbf16, #tpu.memory_space<vmem>>, %arg2: memref<128x512xbf16, #tpu.memory_space<vmem>>, %arg3: memref<1x512xf32, #tpu.memory_space<vmem>>, %arg4: memref<512x4xbf16, #tpu.memory_space<vmem>>, %arg5: memref<1x4xf32, #tpu.memory_space<vmem>>, %arg6: memref<32x4xf32, #tpu.memory_space<vmem>>) attributes {dimension_semantics = [#tpu.dimension_semantics<parallel>], iteration_bounds = array<i64: 4>, scalar_prefetch = 0 : i64, scratch_operands = 0 : i64, tpu.core_type = #tpu.core_type<tc>, window_params = [{transform_indices = @transform_0, window_bounds = array<i64: 32, 128>}, {pipeline_mode = #tpu.pipeline_mode<synchronous>, transform_indices = @transform_1, window_bounds = array<i64: 128, 512>}, {pipeline_mode = #tpu.pipeline_mode<synchronous>, transform_indices = @transform_2, window_bounds = array<i64: 1, 512>}, {pipeline_mode = #tpu.pipeline_mode<synchronous>, transform_indices = @transform_3, window_bounds = array<i64: 512, 4>}, {pipeline_mode = #tpu.pipeline_mode<synchronous>, transform_indices = @transform_4, window_bounds = array<i64: 1, 4>}, {transform_indices = @transform_5, window_bounds = array<i64: 32, 4>}]} {
    %c0 = arith.constant 0 : index
    %c0_0 = arith.constant 0 : index
    %0 = vector.load %arg1[%c0, %c0_0] : memref<32x128xbf16, #tpu.memory_space<vmem>>, vector<32x128xbf16>
    %c0_1 = arith.constant 0 : index
    %c0_2 = arith.constant 0 : index
    %1 = vector.load %arg2[%c0_1, %c0_2] : memref<128x512xbf16, #tpu.memory_space<vmem>>, vector<128x512xbf16>
    %cst = arith.constant dense<0.000000e+00> : vector<32x512xf32>
    %2 = tpu.matmul %0, %1, %cst {dimension_numbers = #tpu.dot_dimension_numbers<[1], [0], [0], [1], [0, 0, 1, 1], [], []>} : vector<32x128xbf16>, vector<128x512xbf16>, vector<32x512xf32> -> vector<32x512xf32>
    %c0_3 = arith.constant 0 : index
    %c0_4 = arith.constant 0 : index
    %3 = vector.load %arg3[%c0_3, %c0_4] : memref<1x512xf32, #tpu.memory_space<vmem>>, vector<1x512xf32>
    %4 = vector.broadcast %3 : vector<1x512xf32> to vector<32x512xf32>
    %5 = arith.addf %2, %4 : vector<32x512xf32>
    %cst_5 = arith.constant 0.000000e+00 : f32
    %6 = vector.broadcast %cst_5 : f32 to vector<32x512xf32>
    %7 = arith.maximumf %5, %6 : vector<32x512xf32>
    %8 = arith.truncf %7 : vector<32x512xf32> to vector<32x512xbf16>
    %c0_6 = arith.constant 0 : index
    %c0_7 = arith.constant 0 : index
    %9 = vector.load %arg4[%c0_6, %c0_7] : memref<512x4xbf16, #tpu.memory_space<vmem>>, vector<512x4xbf16>
    %cst_8 = arith.constant dense<0.000000e+00> : vector<32x4xf32>
    %10 = tpu.matmul %8, %9, %cst_8 {dimension_numbers = #tpu.dot_dimension_numbers<[1], [0], [0], [1], [0, 0, 1, 1], [], []>} : vector<32x512xbf16>, vector<512x4xbf16>, vector<32x4xf32> -> vector<32x4xf32>
    %c0_9 = arith.constant 0 : index
    %c0_10 = arith.constant 0 : index
    %11 = vector.load %arg5[%c0_9, %c0_10] : memref<1x4xf32, #tpu.memory_space<vmem>>, vector<1x4xf32>
    %12 = vector.broadcast %11 : vector<1x4xf32> to vector<32x4xf32>
    %13 = arith.addf %10, %12 : vector<32x4xf32>
    %c0_11 = arith.constant 0 : index
    %c0_12 = arith.constant 0 : index
    %14 = vector.load %arg6[%c0_11, %c0_12] : memref<32x4xf32, #tpu.memory_space<vmem>>, vector<32x4xf32>
    tpu.vector_store %arg6[%c0_11, %c0_12], %13 {strides = array<i32>} : memref<32x4xf32, #tpu.memory_space<vmem>>, vector<32x4xf32>,
    return
  }
  func.func @transform_0(%arg0: i32) -> (i32, i32) {
    %c0_i32 = arith.constant 0 : i32
    %c0_i32_0 = arith.constant 0 : i32
    return %arg0, %c0_i32 : i32, i32
  }
  func.func @transform_1(%arg0: i32) -> (i32, i32) {
    %c0_i32 = arith.constant 0 : i32
    %c0_i32_0 = arith.constant 0 : i32
    %c0_i32_1 = arith.constant 0 : i32
    return %c0_i32, %c0_i32_0 : i32, i32
  }
  func.func @transform_2(%arg0: i32) -> (i32, i32) {
    %c0_i32 = arith.constant 0 : i32
    %c0_i32_0 = arith.constant 0 : i32
    %c0_i32_1 = arith.constant 0 : i32
    return %c0_i32, %c0_i32_0 : i32, i32
  }
  func.func @transform_3(%arg0: i32) -> (i32, i32) {
    %c0_i32 = arith.constant 0 : i32
    %c0_i32_0 = arith.constant 0 : i32
    %c0_i32_1 = arith.constant 0 : i32
    return %c0_i32, %c0_i32_0 : i32, i32
  }
  func.func @transform_4(%arg0: i32) -> (i32, i32) {
    %c0_i32 = arith.constant 0 : i32
    %c0_i32_0 = arith.constant 0 : i32
    %c0_i32_1 = arith.constant 0 : i32
    return %c0_i32, %c0_i32_0 : i32, i32
  }
  func.func @transform_5(%arg0: i32) -> (i32, i32) {
    %c0_i32 = arith.constant 0 : i32
    %c0_i32_0 = arith.constant 0 : i32
    return %arg0, %c0_i32 : i32, i32
  }
}

module attributes {stable_mosaic.version = 11 : i64} {
  func.func @_fuse_kernel(%arg0: i32, %arg1: memref<32x128xf32, #tpu.memory_space<vmem>>, %arg2: memref<32x128xbf16, #tpu.memory_space<vmem>>, %arg3: memref<128x128xbf16, #tpu.memory_space<vmem>>, %arg4: memref<1x128xf32, #tpu.memory_space<vmem>>, %arg5: memref<32x128xbf16, #tpu.memory_space<vmem>>) attributes {dimension_semantics = [#tpu.dimension_semantics<parallel>], iteration_bounds = array<i64: 4>, scalar_prefetch = 0 : i64, scratch_operands = 0 : i64, tpu.core_type = #tpu.core_type<tc>, window_params = [{transform_indices = @transform_0, window_bounds = array<i64: 32, 128>}, {transform_indices = @transform_1, window_bounds = array<i64: 32, 128>}, {pipeline_mode = #tpu.pipeline_mode<synchronous>, transform_indices = @transform_2, window_bounds = array<i64: 128, 128>}, {pipeline_mode = #tpu.pipeline_mode<synchronous>, transform_indices = @transform_3, window_bounds = array<i64: 1, 128>}, {transform_indices = @transform_4, window_bounds = array<i64: 32, 128>}]} {
    %c0 = arith.constant 0 : index
    %c0_0 = arith.constant 0 : index
    %0 = vector.load %arg2[%c0, %c0_0] : memref<32x128xbf16, #tpu.memory_space<vmem>>, vector<32x128xbf16>
    %c0_1 = arith.constant 0 : index
    %c0_2 = arith.constant 0 : index
    %1 = vector.load %arg3[%c0_1, %c0_2] : memref<128x128xbf16, #tpu.memory_space<vmem>>, vector<128x128xbf16>
    %cst = arith.constant dense<0.000000e+00> : vector<32x128xf32>
    %2 = tpu.matmul %0, %1, %cst {dimension_numbers = #tpu.dot_dimension_numbers<[1], [0], [0], [1], [0, 0, 1, 1], [], []>} : vector<32x128xbf16>, vector<128x128xbf16>, vector<32x128xf32> -> vector<32x128xf32>
    %c0_3 = arith.constant 0 : index
    %c0_4 = arith.constant 0 : index
    %3 = vector.load %arg4[%c0_3, %c0_4] : memref<1x128xf32, #tpu.memory_space<vmem>>, vector<1x128xf32>
    %4 = vector.broadcast %3 : vector<1x128xf32> to vector<32x128xf32>
    %5 = arith.addf %2, %4 : vector<32x128xf32>
    %c0_5 = arith.constant 0 : index
    %c0_6 = arith.constant 0 : index
    %6 = vector.load %arg1[%c0_5, %c0_6] : memref<32x128xf32, #tpu.memory_space<vmem>>, vector<32x128xf32>
    %7 = arith.addf %5, %6 : vector<32x128xf32>
    %8 = arith.truncf %7 : vector<32x128xf32> to vector<32x128xbf16>
    %c0_7 = arith.constant 0 : index
    %c0_8 = arith.constant 0 : index
    %9 = vector.load %arg5[%c0_7, %c0_8] : memref<32x128xbf16, #tpu.memory_space<vmem>>, vector<32x128xbf16>
    tpu.vector_store %arg5[%c0_7, %c0_8], %8 {strides = array<i32>} : memref<32x128xbf16, #tpu.memory_space<vmem>>, vector<32x128xbf16>,
    return
  }
  func.func @transform_0(%arg0: i32) -> (i32, i32) {
    %c0_i32 = arith.constant 0 : i32
    %c0_i32_0 = arith.constant 0 : i32
    return %arg0, %c0_i32 : i32, i32
  }
  func.func @transform_1(%arg0: i32) -> (i32, i32) {
    %c0_i32 = arith.constant 0 : i32
    %c0_i32_0 = arith.constant 0 : i32
    return %arg0, %c0_i32 : i32, i32
  }
  func.func @transform_2(%arg0: i32) -> (i32, i32) {
    %c0_i32 = arith.constant 0 : i32
    %c0_i32_0 = arith.constant 0 : i32
    %c0_i32_1 = arith.constant 0 : i32
    return %c0_i32, %c0_i32_0 : i32, i32
  }
  func.func @transform_3(%arg0: i32) -> (i32, i32) {
    %c0_i32 = arith.constant 0 : i32
    %c0_i32_0 = arith.constant 0 : i32
    %c0_i32_1 = arith.constant 0 : i32
    return %c0_i32, %c0_i32_0 : i32, i32
  }
  func.func @transform_4(%arg0: i32) -> (i32, i32) {
    %c0_i32 = arith.constant 0 : i32
    %c0_i32_0 = arith.constant 0 : i32
    return %arg0, %c0_i32 : i32, i32
  }
}

</mosaic_0001>

<bundles_post_ra>
// kernel: fno2d_forward.6
= control target key start
LH: loop header
LB: loop body
LE: loop exit
PB: predicated region body
PF: predicated region fallthrough
CT: control target
= control target key end

     0   :  { %s364_s12 = smov 0   ;;  %s390_s0 = inlined_call_operand.vmem [shape: f32[128,12], index: 0, kind: input, shape index: {}]   ;;  %s391_s1 = inlined_call_operand.vmem [shape: f32[12,128], index: 1, kind: input, shape index: {}]   ;;  %s392_s2 = inlined_call_operand.vmem [shape: f32[1,128], index: 2, kind: input, shape index: {}]   ;;  %s393_s3 = inlined_call_operand.vmem [shape: bf16[128,128], index: 3, kind: output, shape index: {}]  }
   0x1 LB: > { %s294_s13 = sadd.s32 4294967295, %s342_s12   ;;  %p298_p0 = scmp.ge.s32.totalorder %s342_s12, 1  ;;  %s342_s12 = sphi %s364_s12, %s13_s12  }
   0x2   : > { %p138_p1 = scmp.lt.s32.totalorder %s342_s12, 5 }
   0x4   : > { %p139_p2 = pnand %p298_p0, %p138_p1 }
   0x5   : > { %s299_s18 = sshll.u32 (!%p139_p2), %s294_s13, 2 }
   0x6   : > { %142 = sbr.rel (%p139_p2) target bundleno = 153 (0x99), region = 32  ;;  %p163_p3 = scmp.lt.s32.totalorder (!%p139_p2), %s299_s18, 15 }
   0xb   : > { %v179_v0 = vld [vmem:[%s391_s1 + $0x8] sm:$0xf]  ;;  %vm197_vm0 = vcmask 1043456   ;;  %v178_v1 = vld [vmem:[%s391_s1] sm:$0xff]  ;;  %s395_s18 = smov (!%p163_p3, %s299_s18), 15  ;;  %vm184_vm1 = vcmask 97280  }
   0xc   : > { %322 = vmatpush.msk.msra.mxu2 %vm197_vm0, %v179_v0  ;;  %323 = vmatpush.msk.msra.mxu3 %vm197_vm0, %v179_v0  ;;  %s300_s19 = sshll.u32 %s395_s18, 3  ;;  %v335_v6 = vld [vmem:[%s392_s2] ss:$0 sm:$0xff]  ;;  %s302_s25 = sshll.u32 %s395_s18, 2 }
   0xd   : > { %303 = vmatpush.msk.msra.mxu0 %vm197_vm0, %v179_v0  ;;  %321 = vmatpush.msk.msra.mxu1 %vm197_vm0, %v179_v0  ;;  %s166_s22 = scalar_lea.vmem %s390_s0, %s300_s19  ;;  %s172_s28 = scalar_lea.vmem %s393_s3, %s302_s25 }
   0xe   : > { %325 = vmatpush.msra.mxu2 %v178_v1  ;;  %326 = vmatpush.msra.mxu3 %v178_v1  ;;  %v176_v2 = vld [vmem:[%s166_s22 + $0x10] sm:$0xff]  ;;  %v177_v3 = vld [vmem:[%s166_s22 + $0x18] sm:$0xff]  ;;  %v174_v4 = vld [vmem:[%s166_s22] sm:$0xff] }
   0xf   : > { %216 = vmatpush.msra.mxu0 %v178_v1  ;;  %324 = vmatpush.msra.mxu1 %v178_v1  ;;  %v175_v5 = vld [vmem:[%s166_s22 + $0x8] sm:$0xff] }
  0x10   : > { %306 = vmatmul.msk.f32.vlgmr.msra.gmra.mxu2 %vm184_vm1, %v176_v2  ;;  %307 = vmatmul.msk.f32.vlgmr.msra.gmra.mxu3 %vm184_vm1, %v177_v3 }
  0x11   : > { %304 = vmatmul.msk.f32.vlgmr.msra.gmra.mxu0 %vm184_vm1, %v174_v4  ;;  %305 = vmatmul.msk.f32.vlgmr.msra.gmra.mxu1 %vm184_vm1, %v175_v5 }
  0x8e   : > { %v218_v7 = vpop.f32.mrf.mxu0  ;;  %v221_v8 = vpop.f32.mrf.mxu1 }
  0x8f   : > { %v219_v9 = vadd.f32 %v335_v6, %v218_v7  ;;  %v222_v10 = vadd.f32 %v335_v6, %v221_v8 }
  0x91   : > { %v313_v11 = vpack.c.bf16 %v222_v10, %v219_v9 }
  0x93   : > { %314 = vst [vmem:[%s172_s28] sm:$0xff] %v313_v11   ;;  %v224_v12 = vpop.f32.mrf.mxu2  ;;  %v227_v13 = vpop.f32.mrf.mxu3 }
  0x94   : > { %v225_v14 = vadd.f32 %v335_v6, %v224_v12  ;;  %v228_v15 = vadd.f32 %v335_v6, %v227_v13 }
  0x96   : > { %v318_v16 = vpack.c.bf16 %v228_v15, %v225_v14 }
  0x98   : > { %320 = vst [vmem:[%s172_s28 + $0x8] sm:$0xff] %v318_v16  }
  0x99 PF: > { %s13_s12 = sadd.s32 1, %s342_s12  }
  0x9a   : > { %p10_p4 = scmp.ge.s32.totalorder %s13_s12, 6  }
  0x9c   :  { %12 = sbr.rel (!%p10_p4) target bundleno = 1 (0x1), region = 62 }

// kernel: custom-call.6
= control target key start
LH: loop header
LB: loop body
LE: loop exit
PB: predicated region body
PF: predicated region fallthrough
CT: control target
= control target key end

     0   :  { %2 = vsyncpa [#allocation0], 0  ;;  %s55_s0 = inlined_call_operand.hbm [shape: c64[32,32,4,4], index: 0, kind: input, shape index: {}]   ;;  %s56_s1 = inlined_call_operand.vmem [shape: f32[32,32,4,4], index: 1, kind: output, shape index: {}]  }
   0x1   :  { %s4_s8 = sshll.u32 %s55_s0, 4  ;;  %s6_s11 = sshll.u32 %s56_s1, 4  ;;  %s5_s8 = int_to_ptr.hbm [resolvable:$true] %s4_s8  ;;  %s7_s11 = int_to_ptr.vmem [resolvable:$true] %s6_s11 }
   0x2   :  { %9 = dma.hbm_to_vmem [thread:$0]  %s5_s8, 8192, %s7_s11, [#allocation0] }
   0x3   :  { %37 = dma.done.wait [#allocation0], 8192  }
   0x4   :  { %38 = vsyncadd [#allocation0], 4294959104 }
   0x5   :  { %12 = vsyncpa [#allocation0], 1 }

// kernel: custom-call.7
= control target key start
LH: loop header
LB: loop body
LE: loop exit
PB: predicated region body
PF: predicated region fallthrough
CT: control target
= control target key end

     0   :  { %s56_s0 = inlined_call_operand.hbm [shape: c64[32,32,4,4], index: 0, kind: input, shape index: {}]   ;;  %s57_s1 = inlined_call_operand.vmem [shape: f32[32,32,4,4], index: 1, kind: output, shape index: {}]  }
   0x1   :  { %s2_s8 = scalar_lea.hbm %s56_s0, 512 }
   0x2   :  { %3 = vsyncpa [#allocation0], 0  ;;  %s5_s9 = sshll.u32 %s2_s8, 4  ;;  %s7_s12 = sshll.u32 %s57_s1, 4  ;;  %s6_s9 = int_to_ptr.hbm [resolvable:$true] %s5_s9  ;;  %s8_s12 = int_to_ptr.vmem [resolvable:$true] %s7_s12 }
   0x3   :  { %10 = dma.hbm_to_vmem [thread:$0]  %s6_s9, 8192, %s8_s12, [#allocation0] }
   0x4   :  { %38 = dma.done.wait [#allocation0], 8192  }
   0x5   :  { %39 = vsyncadd [#allocation0], 4294959104 }
   0x6   :  { %13 = vsyncpa [#allocation0], 1 }

// kernel: reverse.8
= control target key start
LH: loop header
LB: loop body
LE: loop exit
PB: predicated region body
PF: predicated region fallthrough
CT: control target
= control target key end

     0   :  { %s344_s0 = inlined_call_operand.vmem [shape: f32[2,32,16,7], index: 0, kind: input, shape index: {}]   ;;  %s345_s1 = inlined_call_operand.vmem [shape: f32[2,32,16,7], index: 1, kind: output, shape index: {}]  }
   0x1   :  { %v112_v0 = vld [vmem:[%s344_s0 + $0x60] sm:$0xff]  ;;  %v113_v1 = vld [vmem:[%s344_s0 + $0xd0] sm:$0xff]  ;;  %v138_v14 = vld [vmem:[%s344_s0 + $0x68] sm:$0xff] }
   0x2   :  { %v115_v2 = vld [vmem:[%s344_s0 + $0x50] sm:$0xff]  ;;  %4 = vst [vmem:[%s345_s1] sm:$0xff] %v112_v0  ;;  %v117_v3 = vld [vmem:[%s344_s0 + $0xc0] sm:$0xff]  ;;  %v140_v15 = vld [vmem:[%s344_s0 + $0xd8] sm:$0xff] }
   0x3   :  { %114 = vst [vmem:[%s345_s1 + $0x70] sm:$0xff] %v113_v1  ;;  %v119_v4 = vld [vmem:[%s344_s0 + $0x40] sm:$0xff]  ;;  %v121_v5 = vld [vmem:[%s344_s0 + $0xb0] sm:$0xff]  ;;  %v142_v16 = vld [vmem:[%s344_s0 + $0x58] sm:$0xff] }
   0x4   :  { %116 = vst [vmem:[%s345_s1 + $0x10] sm:$0xff] %v115_v2  ;;  %v123_v6 = vld [vmem:[%s344_s0 + $0x30] sm:$0xff]  ;;  %v125_v7 = vld [vmem:[%s344_s0 + $0xa0] sm:$0xff]  ;;  %v144_v17 = vld [vmem:[%s344_s0 + $0xc8] sm:$0xff] }
   0x5   :  { %118 = vst [vmem:[%s345_s1 + $0x80] sm:$0xff] %v117_v3  ;;  %v127_v8 = vld [vmem:[%s344_s0 + $0x20] sm:$0xff]  ;;  %v129_v9 = vld [vmem:[%s344_s0 + $0x90] sm:$0xff]  ;;  %v146_v18 = vld [vmem:[%s344_s0 + $0x48] sm:$0xff] }
   0x6   :  { %120 = vst [vmem:[%s345_s1 + $0x20] sm:$0xff] %v119_v4  ;;  %v131_v10 = vld [vmem:[%s344_s0 + $0x10] sm:$0xff]  ;;  %v133_v11 = vld [vmem:[%s344_s0 + $0x80] sm:$0xff]  ;;  %v148_v19 = vld [vmem:[%s344_s0 + $0xb8] sm:$0xff] }
   0x7   :  { %122 = vst [vmem:[%s345_s1 + $0x90] sm:$0xff] %v121_v5  ;;  %v49_v12 = vld [vmem:[%s344_s0] sm:$0xff]  ;;  %v136_v13 = vld [vmem:[%s344_s0 + $0x70] sm:$0xff]  ;;  %v150_v20 = vld [vmem:[%s344_s0 + $0x38] sm:$0xff] }
   0x8   :  { %124 = vst [vmem:[%s345_s1 + $0x30] sm:$0xff] %v123_v6  ;;  %v152_v21 = vld [vmem:[%s344_s0 + $0xa8] sm:$0xff]  ;;  %v156_v23 = vld [vmem:[%s344_s0 + $0x98] sm:$0xff] }
   0x9   :  { %126 = vst [vmem:[%s345_s1 + $0xa0] sm:$0xff] %v125_v7  ;;  %v154_v22 = vld [vmem:[%s344_s0 + $0x28] sm:$0xff]  ;;  %v158_v24 = vld [vmem:[%s344_s0 + $0x18] sm:$0xff] }
   0xa   :  { %128 = vst [vmem:[%s345_s1 + $0x40] sm:$0xff] %v127_v8  ;;  %v160_v25 = vld [vmem:[%s344_s0 + $0x88] sm:$0xff]  ;;  %v164_v27 = vld [vmem:[%s344_s0 + $0x78] sm:$0xff] }
   0xb   :  { %130 = vst [vmem:[%s345_s1 + $0xb0] sm:$0xff] %v129_v9  ;;  %v162_v26 = vld [vmem:[%s344_s0 + $0x8] sm:$0xff] }
   0xc   :  { %132 = vst [vmem:[%s345_s1 + $0x50] sm:$0xff] %v131_v10 }
   0xd   :  { %134 = vst [vmem:[%s345_s1 + $0xc0] sm:$0xff] %v133_v11 }
   0xe   :  { %135 = vst [vmem:[%s345_s1 + $0x60] sm:$0xff] %v49_v12 }
   0xf   :  { %137 = vst [vmem:[%s345_s1 + $0xd0] sm:$0xff] %v136_v13 }
  0x10   :  { %139 = vst [vmem:[%s345_s1 + $0x8] sm:$0xff] %v138_v14 }
  0x11   :  { %141 = vst [vmem:[%s345_s1 + $0x78] sm:$0xff] %v140_v15 }
  0x12   :  { %143 = vst [vmem:[%s345_s1 + $0x18] sm:$0xff] %v142_v16 }
  0x13   :  { %145 = vst [vmem:[%s345_s1 + $0x88] sm:$0xff] %v144_v17 }
  0x14   :  { %147 = vst [vmem:[%s345_s1 + $0x28] sm:$0xff] %v146_v18 }
  0x15   :  { %149 = vst [vmem:[%s345_s1 + $0x98] sm:$0xff] %v148_v19 }
  0x16   :  { %151 = vst [vmem:[%s345_s1 + $0x38] sm:$0xff] %v150_v20 }
  0x17   :  { %153 = vst [vmem:[%s345_s1 + $0xa8] sm:$0xff] %v152_v21 }
  0x18   :  { %155 = vst [vmem:[%s345_s1 + $0x48] sm:$0xff] %v154_v22 }
  0x19   :  { %157 = vst [vmem:[%s345_s1 + $0xb8] sm:$0xff] %v156_v23 }
  0x1a   :  { %159 = vst [vmem:[%s345_s1 + $0x58] sm:$0xff] %v158_v24 }
  0x1b   :  { %161 = vst [vmem:[%s345_s1 + $0xc8] sm:$0xff] %v160_v25 }
  0x1c   :  { %163 = vst [vmem:[%s345_s1 + $0x68] sm:$0xff] %v162_v26 }
  0x1d   :  { %165 = vst [vmem:[%s345_s1 + $0xd8] sm:$0xff] %v164_v27 }

// kernel: fno2d_forward.7
= control target key start
LH: loop header
LB: loop body
LE: loop exit
PB: predicated region body
PF: predicated region fallthrough
CT: control target
= control target key end

     0   :  { %s538_s15 = smov 0   ;;  %s593_s0 = inlined_call_operand.vmem [shape: f32[128,128], index: 0, kind: input, shape index: {}]   ;;  %s594_s1 = inlined_call_operand.vmem [shape: bf16[128,128], index: 1, kind: input, shape index: {}]   ;;  %s595_s2 = inlined_call_operand.vmem [shape: bf16[128,128], index: 2, kind: input, shape index: {}]   ;;  %s596_s3 = inlined_call_operand.vmem [shape: f32[1,128], index: 3, kind: input, shape index: {}]   ;;  %s597_s4 = inlined_call_operand.vmem [shape: bf16[128,128], index: 4, kind: output, shape index: {}]  }
   0x1 LB: > { %s414_s16 = sadd.s32 4294967295, %s511_s15   ;;  %p418_p0 = scmp.ge.s32.totalorder %s511_s15, 1  ;;  %s511_s15 = sphi %s538_s15, %s14_s15  }
   0x2   : > { %p174_p1 = scmp.lt.s32.totalorder %s511_s15, 5 }
   0x4   : > { %p175_p2 = pnand %p418_p0, %p174_p1 }
   0x5   : > { %s419_s25 = sshll.u32 (!%p175_p2), %s414_s16, 2 }
   0x6   : > { %178 = sbr.rel (%p175_p2) target bundleno = 187 (0xbb), region = 36  ;;  %p206_p3 = scmp.lt.s32.totalorder (!%p175_p2), %s419_s25, 15 }
   0xb   : > { %v476_v0 = vld [vmem:[%s595_s2 + $0x38] sm:$0xff]  ;;  %v475_v1 = vld [vmem:[%s595_s2 + $0x30] sm:$0xff]  ;;  %v474_v2 = vld [vmem:[%s595_s2 + $0x28] sm:$0xff]  ;;  %s599_s25 = smov (!%p206_p3, %s419_s25), 15 }
   0xc   : > { %307 = vmatpush.bf16.msra.mxu0 %v476_v0  ;;  %488 = vmatpush.bf16.msra.mxu1 %v476_v0  ;;  %v473_v3 = vld [vmem:[%s595_s2 + $0x20] sm:$0xff]  ;;  %v472_v4 = vld [vmem:[%s595_s2 + $0x18] sm:$0xff]  ;;  %v471_v5 = vld [vmem:[%s595_s2 + $0x10] sm:$0xff]  ;;  %s422_s6 = sshll.u32 %s599_s25, 2  ;;  %s420_s12 = sshll.u32 %s599_s25, 3 }
   0xd   : > { %v470_v6 = vld [vmem:[%s595_s2 + $0x8] sm:$0xff]  ;;  %v469_v7 = vld [vmem:[%s595_s2] sm:$0xff]  ;;  %s215_s11 = scalar_lea.vmem %s594_s1, %s422_s6  ;;  %s209_s18 = scalar_lea.vmem %s593_s0, %s420_s12 }
   0xe   : > { %v467_v8 = vld [vmem:[%s215_s11] sm:$0xff]  ;;  %v468_v9 = vld [vmem:[%s215_s11 + $0x8] sm:$0xff]  ;;  %v328_v16 = vld [vmem:[%s209_s18 + $0x10] sm:$0xff]  ;;  %s221_s21 = scalar_lea.vmem %s597_s4, %s422_s6 }
   0xf   : > { %v504_v12 = vld [vmem:[%s596_s3] ss:$0 sm:$0xff]  ;;  %v327_v18 = vld [vmem:[%s209_s18 + $0x8] sm:$0xff]  ;;  %v329_v20 = vld [vmem:[%s209_s18 + $0x18] sm:$0xff] }
  0x10   : > { %308 = vmatpush.bf16.msra.mxu0 %v475_v1  ;;  %489 = vmatpush.bf16.msra.mxu1 %v475_v1  ;;  %v326_v15 = vld [vmem:[%s209_s18] sm:$0xff] }
  0x14   : > { %309 = vmatpush.bf16.msra.mxu0 %v474_v2  ;;  %490 = vmatpush.bf16.msra.mxu1 %v474_v2 }
  0x18   : > { %310 = vmatpush.bf16.msra.mxu0 %v473_v3  ;;  %491 = vmatpush.bf16.msra.mxu1 %v473_v3 }
  0x1c   : > { %311 = vmatpush.bf16.msra.mxu0 %v472_v4  ;;  %492 = vmatpush.bf16.msra.mxu1 %v472_v4 }
  0x20   : > { %312 = vmatpush.bf16.msra.mxu0 %v471_v5  ;;  %493 = vmatpush.bf16.msra.mxu1 %v471_v5 }
  0x24   : > { %313 = vmatpush.bf16.msra.mxu0 %v470_v6  ;;  %494 = vmatpush.bf16.msra.mxu1 %v470_v6 }
  0x28   : > { %314 = vmatpush.bf16.msra.mxu0 %v469_v7  ;;  %495 = vmatpush.bf16.msra.mxu1 %v469_v7 }
  0x2b   : > { %315 = vmatmul.bf16.vlgmr.msra.gmra.mxu0 %v467_v8  ;;  %320 = vmatmul.bf16.vlgmr.msra.gmra.mxu1 %v468_v9 }
  0xa8   : > { %v316_v10 = vpop.f32.mrf.mxu0  ;;  %v321_v11 = vpop.f32.mrf.mxu1 }
  0xa9   : > { %v317_v13 = vadd.f32 %v504_v12, %v316_v10  ;;  %v322_v14 = vadd.f32 %v504_v12, %v321_v11 }
  0xab   : > { %v330_v21 = vadd.f32 %v326_v15, %v317_v13  ;;  %v332_v22 = vadd.f32 %v328_v16, %v322_v14 }
  0xad   : > { %v334_v27 = vmax.f32 %v330_v21, 0.0  ;;  %v336_v28 = vmax.f32 %v332_v22, 0.0 }
  0xb0   : > { %v318_v17 = vpop.f32.mrf.mxu0  ;;  %v323_v19 = vpop.f32.mrf.mxu1 }
  0xb1   : > { %v319_v23 = vadd.f32 %v504_v12, %v318_v17  ;;  %v324_v24 = vadd.f32 %v504_v12, %v323_v19 }
  0xb3   : > { %v331_v25 = vadd.f32 %v327_v18, %v319_v23  ;;  %v333_v26 = vadd.f32 %v329_v20, %v324_v24 }
  0xb5   : > { %v335_v29 = vmax.f32 %v331_v25, 0.0  ;;  %v337_v30 = vmax.f32 %v333_v26, 0.0 }
  0xb7   : > { %v480_v31 = vpack.c.bf16 %v335_v29, %v334_v27  ;;  %v485_v32 = vpack.c.bf16 %v337_v30, %v336_v28 }
  0xb9   : > { %481 = vst [vmem:[%s221_s21] sm:$0xff] %v480_v31  }
  0xba   : > { %487 = vst [vmem:[%s221_s21 + $0x8] sm:$0xff] %v485_v32  }
  0xbb PF: > { %s14_s15 = sadd.s32 1, %s511_s15  }
  0xbc   : > { %p11_p4 = scmp.ge.s32.totalorder %s14_s15, 6  }
  0xbe   :  { %13 = sbr.rel (!%p11_p4) target bundleno = 1 (0x1), region = 69 }

// kernel: fno2d_forward.10
= control target key start
LH: loop header
LB: loop body
LE: loop exit
PB: predicated region body
PF: predicated region fallthrough
CT: control target
= control target key end

     0   :  { %s534_s15 = smov 0   ;;  %s589_s0 = inlined_call_operand.vmem [shape: f32[128,128], index: 0, kind: input, shape index: {}]   ;;  %s590_s1 = inlined_call_operand.vmem [shape: bf16[128,128], index: 1, kind: input, shape index: {}]   ;;  %s591_s2 = inlined_call_operand.vmem [shape: bf16[128,128], index: 2, kind: input, shape index: {}]   ;;  %s592_s3 = inlined_call_operand.vmem [shape: f32[1,128], index: 3, kind: input, shape index: {}]   ;;  %s593_s4 = inlined_call_operand.vmem [shape: bf16[128,128], index: 4, kind: output, shape index: {}]  }
   0x1 LB: > { %s410_s16 = sadd.s32 4294967295, %s507_s15   ;;  %p414_p0 = scmp.ge.s32.totalorder %s507_s15, 1  ;;  %s507_s15 = sphi %s534_s15, %s14_s15  }
   0x2   : > { %p174_p1 = scmp.lt.s32.totalorder %s507_s15, 5 }
   0x4   : > { %p175_p2 = pnand %p414_p0, %p174_p1 }
   0x5   : > { %s415_s25 = sshll.u32 (!%p175_p2), %s410_s16, 2 }
   0x6   : > { %178 = sbr.rel (%p175_p2) target bundleno = 185 (0xb9), region = 36  ;;  %p206_p3 = scmp.lt.s32.totalorder (!%p175_p2), %s415_s25, 15 }
   0xb   : > { %v472_v0 = vld [vmem:[%s591_s2 + $0x38] sm:$0xff]  ;;  %v471_v1 = vld [vmem:[%s591_s2 + $0x30] sm:$0xff]  ;;  %v470_v2 = vld [vmem:[%s591_s2 + $0x28] sm:$0xff]  ;;  %s595_s25 = smov (!%p206_p3, %s415_s25), 15 }
   0xc   : > { %307 = vmatpush.bf16.msra.mxu0 %v472_v0  ;;  %484 = vmatpush.bf16.msra.mxu1 %v472_v0  ;;  %v469_v3 = vld [vmem:[%s591_s2 + $0x20] sm:$0xff]  ;;  %v468_v4 = vld [vmem:[%s591_s2 + $0x18] sm:$0xff]  ;;  %v467_v5 = vld [vmem:[%s591_s2 + $0x10] sm:$0xff]  ;;  %s418_s6 = sshll.u32 %s595_s25, 2  ;;  %s416_s12 = sshll.u32 %s595_s25, 3 }
   0xd   : > { %v466_v6 = vld [vmem:[%s591_s2 + $0x8] sm:$0xff]  ;;  %v465_v7 = vld [vmem:[%s591_s2] sm:$0xff]  ;;  %s215_s11 = scalar_lea.vmem %s590_s1, %s418_s6  ;;  %s209_s18 = scalar_lea.vmem %s589_s0, %s416_s12 }
   0xe   : > { %v463_v8 = vld [vmem:[%s215_s11] sm:$0xff]  ;;  %v464_v9 = vld [vmem:[%s215_s11 + $0x8] sm:$0xff]  ;;  %v328_v16 = vld [vmem:[%s209_s18 + $0x10] sm:$0xff]  ;;  %s221_s21 = scalar_lea.vmem %s593_s4, %s418_s6 }
   0xf   : > { %v500_v12 = vld [vmem:[%s592_s3] ss:$0 sm:$0xff]  ;;  %v327_v18 = vld [vmem:[%s209_s18 + $0x8] sm:$0xff]  ;;  %v329_v20 = vld [vmem:[%s209_s18 + $0x18] sm:$0xff] }
  0x10   : > { %308 = vmatpush.bf16.msra.mxu0 %v471_v1  ;;  %485 = vmatpush.bf16.msra.mxu1 %v471_v1  ;;  %v326_v14 = vld [vmem:[%s209_s18] sm:$0xff] }
  0x14   : > { %309 = vmatpush.bf16.msra.mxu0 %v470_v2  ;;  %486 = vmatpush.bf16.msra.mxu1 %v470_v2 }
  0x18   : > { %310 = vmatpush.bf16.msra.mxu0 %v469_v3  ;;  %487 = vmatpush.bf16.msra.mxu1 %v469_v3 }
  0x1c   : > { %311 = vmatpush.bf16.msra.mxu0 %v468_v4  ;;  %488 = vmatpush.bf16.msra.mxu1 %v468_v4 }
  0x20   : > { %312 = vmatpush.bf16.msra.mxu0 %v467_v5  ;;  %489 = vmatpush.bf16.msra.mxu1 %v467_v5 }
  0x24   : > { %313 = vmatpush.bf16.msra.mxu0 %v466_v6  ;;  %490 = vmatpush.bf16.msra.mxu1 %v466_v6 }
  0x28   : > { %314 = vmatpush.bf16.msra.mxu0 %v465_v7  ;;  %491 = vmatpush.bf16.msra.mxu1 %v465_v7 }
  0x2b   : > { %315 = vmatmul.bf16.vlgmr.msra.gmra.mxu0 %v463_v8  ;;  %320 = vmatmul.bf16.vlgmr.msra.gmra.mxu1 %v464_v9 }
  0xa8   : > { %v316_v10 = vpop.f32.mrf.mxu0  ;;  %v321_v11 = vpop.f32.mrf.mxu1 }
  0xa9   : > { %v317_v13 = vadd.f32 %v500_v12, %v316_v10  ;;  %v322_v15 = vadd.f32 %v500_v12, %v321_v11 }
  0xab   : > { %v330_v23 = vadd.f32 %v326_v14, %v317_v13  ;;  %v332_v24 = vadd.f32 %v328_v16, %v322_v15 }
  0xb0   : > { %v318_v17 = vpop.f32.mrf.mxu0  ;;  %v323_v19 = vpop.f32.mrf.mxu1 }
  0xb1   : > { %v319_v21 = vadd.f32 %v500_v12, %v318_v17  ;;  %v324_v22 = vadd.f32 %v500_v12, %v323_v19 }
  0xb3   : > { %v331_v25 = vadd.f32 %v327_v18, %v319_v21  ;;  %v333_v26 = vadd.f32 %v329_v20, %v324_v22 }
  0xb5   : > { %v476_v27 = vpack.c.bf16 %v331_v25, %v330_v23  ;;  %v481_v28 = vpack.c.bf16 %v333_v26, %v332_v24 }
  0xb7   : > { %477 = vst [vmem:[%s221_s21] sm:$0xff] %v476_v27  }
  0xb8   : > { %483 = vst [vmem:[%s221_s21 + $0x8] sm:$0xff] %v481_v28  }
  0xb9 PF: > { %s14_s15 = sadd.s32 1, %s507_s15  }
  0xba   : > { %p11_p4 = scmp.ge.s32.totalorder %s14_s15, 6  }
  0xbc   :  { %13 = sbr.rel (!%p11_p4) target bundleno = 1 (0x1), region = 69 }

// kernel: fno2d_forward.11
= control target key start
LH: loop header
LB: loop body
LE: loop exit
PB: predicated region body
PF: predicated region fallthrough
CT: control target
= control target key end

     0   :  { %s1331_s18 = smov 0   ;;  %s1656_s0 = inlined_call_operand.vmem [shape: bf16[128,128], index: 0, kind: input, shape index: {}]   ;;  %s1657_s1 = inlined_call_operand.vmem [shape: bf16[128,512], index: 1, kind: input, shape index: {}]   ;;  %s1658_s2 = inlined_call_operand.vmem [shape: f32[1,512], index: 2, kind: input, shape index: {}]   ;;  %s1659_s3 = inlined_call_operand.vmem [shape: bf16[512,4], index: 3, kind: input, shape index: {}]   ;;  %s1660_s4 = inlined_call_operand.vmem [shape: f32[1,4], index: 4, kind: input, shape index: {}]   ;;  %s1661_s5 = inlined_call_operand.vmem [shape: f32[128,4], index: 5, kind: output, shape index: {}]  }
   0x1 LB: > { %s943_s19 = sadd.s32 4294967295, %s1299_s18   ;;  %p947_p0 = scmp.ge.s32.totalorder %s1299_s18, 1  ;;  %s1299_s18 = sphi %s1331_s18, %s15_s18  }
   0x2   : > { %p188_p1 = scmp.lt.s32.totalorder %s1299_s18, 5 }
   0x4   : > { %p189_p2 = pnand %p947_p0, %p188_p1 }
   0x5   : > { %s948_s11 = sshll.u32 (!%p189_p2), %s943_s19, 2 }
   0x6   : > { %192 = sbr.rel (%p189_p2) target bundleno = 354 (0x162), region = 40  ;;  %p217_p3 = scmp.lt.s32.totalorder (!%p189_p2), %s948_s11, 15 }
   0xb   : > { %v1074_v0 = vld [vmem:[%s1657_s1 + $0xe0] sm:$0xf]  ;;  %v1250_v1 = vld [vmem:[%s1657_s1 + $0xec] sm:$0xf0]  ;;  %v1248_v2 = vld [vmem:[%s1657_s1 + $0xe4] sm:$0xf] }
   0xc   : > { %v1075_v3 = vor.u32 %v1250_v1, %v1074_v0  ;;  %v1076_v4 = vld [vmem:[%s1657_s1 + $0xf0] sm:$0xf0]  ;;  %v1082_v5 = vld [vmem:[%s1657_s1 + $0xe8] sm:$0xf]  ;;  %v1251_v6 = vld [vmem:[%s1657_s1 + $0xf4] sm:$0xf0] }
   0xd   : > { %v1079_v7 = vor.u32 %v1248_v2, %v1076_v4  ;;  %v1083_v8 = vor.u32 %v1251_v6, %v1082_v5  ;;  %v1249_v9 = vld [vmem:[%s1657_s1 + $0xec] sm:$0xf]  ;;  %v1084_v10 = vld [vmem:[%s1657_s1 + $0xf8] sm:$0xf0]  ;;  %v1058_v11 = vld [vmem:[%s1657_s1 + $0xc0] sm:$0xf] }
   0xe   : > { %446 = vmatpush.bf16.msra.mxu0 %v1075_v3  ;;  %v1087_v12 = vor.u32 %v1249_v9, %v1084_v10  ;;  %v1246_v13 = vld [vmem:[%s1657_s1 + $0xcc] sm:$0xf0]  ;;  %v1244_v14 = vld [vmem:[%s1657_s1 + $0xc4] sm:$0xf]  ;;  %v1060_v15 = vld [vmem:[%s1657_s1 + $0xd0] sm:$0xf0] }
   0xf   : > { %465 = vmatpush.bf16.msra.mxu1 %v1079_v7  ;;  %484 = vmatpush.bf16.msra.mxu2 %v1083_v8  ;;  %v1059_v16 = vor.u32 %v1246_v13, %v1058_v11  ;;  %v1063_v17 = vor.u32 %v1244_v14, %v1060_v15  ;;  %v1066_v18 = vld [vmem:[%s1657_s1 + $0xc8] sm:$0xf]  ;;  %v1247_v19 = vld [vmem:[%s1657_s1 + $0xd4] sm:$0xf0]  ;;  %v1245_v20 = vld [vmem:[%s1657_s1 + $0xcc] sm:$0xf] }
  0x10   : > { %503 = vmatpush.bf16.msra.mxu3 %v1087_v12  ;;  %v1067_v21 = vor.u32 %v1247_v19, %v1066_v18  ;;  %v1068_v22 = vld [vmem:[%s1657_s1 + $0xd8] sm:$0xf0]  ;;  %v1042_v23 = vld [vmem:[%s1657_s1 + $0xa0] sm:$0xf]  ;;  %v1242_v24 = vld [vmem:[%s1657_s1 + $0xac] sm:$0xf0] }
  0x11   : > { %v1071_v25 = vor.u32 %v1245_v20, %v1068_v22  ;;  %v1240_v26 = vld [vmem:[%s1657_s1 + $0xa4] sm:$0xf]  ;;  %v1044_v27 = vld [vmem:[%s1657_s1 + $0xb0] sm:$0xf0]  ;;  %v1050_v28 = vld [vmem:[%s1657_s1 + $0xa8] sm:$0xf]  ;;  %v1043_v29 = vor.u32 %v1242_v24, %v1042_v23 }
  0x12   : > { %447 = vmatpush.bf16.msra.mxu0 %v1059_v16  ;;  %v1243_v30 = vld [vmem:[%s1657_s1 + $0xb4] sm:$0xf0]  ;;  %v1241_v31 = vld [vmem:[%s1657_s1 + $0xac] sm:$0xf]  ;;  %v1052_v32 = vld [vmem:[%s1657_s1 + $0xb8] sm:$0xf0]  ;;  %v1047_v33 = vor.u32 %v1240_v26, %v1044_v27 }
  0x13   : > { %466 = vmatpush.bf16.msra.mxu1 %v1063_v17  ;;  %485 = vmatpush.bf16.msra.mxu2 %v1067_v21  ;;  %v1051_v34 = vor.u32 %v1243_v30, %v1050_v28  ;;  %v1026_v35 = vld [vmem:[%s1657_s1 + $0x80] sm:$0xf]  ;;  %v1238_v36 = vld [vmem:[%s1657_s1 + $0x8c] sm:$0xf0]  ;;  %v1236_v37 = vld [vmem:[%s1657_s1 + $0x84] sm:$0xf]  ;;  %v1055_v38 = vor.u32 %v1241_v31, %v1052_v32 }
  0x14   : > { %504 = vmatpush.bf16.msra.mxu3 %v1071_v25  ;;  %v1028_v39 = vld [vmem:[%s1657_s1 + $0x90] sm:$0xf0]  ;;  %v1034_v40 = vld [vmem:[%s1657_s1 + $0x88] sm:$0xf]  ;;  %v1239_v41 = vld [vmem:[%s1657_s1 + $0x94] sm:$0xf0]  ;;  %v1027_v44 = vor.u32 %v1238_v36, %v1026_v35 }
  0x15   : > { %v1237_v42 = vld [vmem:[%s1657_s1 + $0x8c] sm:$0xf]  ;;  %v1036_v43 = vld [vmem:[%s1657_s1 + $0x98] sm:$0xf0]  ;;  %v1031_v45 = vor.u32 %v1236_v37, %v1028_v39  ;;  %v1035_v46 = vor.u32 %v1239_v41, %v1034_v40  ;;  %v1010_v47 = vld [vmem:[%s1657_s1 + $0x60] sm:$0xf] }
  0x16   : > { %448 = vmatpush.bf16.msra.mxu0 %v1043_v29  ;;  %v1234_v48 = vld [vmem:[%s1657_s1 + $0x6c] sm:$0xf0]  ;;  %v1232_v49 = vld [vmem:[%s1657_s1 + $0x64] sm:$0xf]  ;;  %v1039_v50 = vor.u32 %v1237_v42, %v1036_v43  ;;  %v1012_v51 = vld [vmem:[%s1657_s1 + $0x70] sm:$0xf0] }
  0x17   : > { %467 = vmatpush.bf16.msra.mxu1 %v1047_v33  ;;  %486 = vmatpush.bf16.msra.mxu2 %v1051_v34  ;;  %v1018_v52 = vld [vmem:[%s1657_s1 + $0x68] sm:$0xf]  ;;  %v1235_v53 = vld [vmem:[%s1657_s1 + $0x74] sm:$0xf0]  ;;  %v1233_v54 = vld [vmem:[%s1657_s1 + $0x6c] sm:$0xf]  ;;  %v1011_v56 = vor.u32 %v1234_v48, %v1010_v47  ;;  %v1015_v57 = vor.u32 %v1232_v49, %v1012_v51 }
  0x18   : > { %505 = vmatpush.bf16.msra.mxu3 %v1055_v38  ;;  %v1020_v55 = vld [vmem:[%s1657_s1 + $0x78] sm:$0xf0]  ;;  %v1019_v58 = vor.u32 %v1235_v53, %v1018_v52  ;;  %v994_v59 = vld [vmem:[%s1657_s1 + $0x40] sm:$0xf]  ;;  %v1230_v60 = vld [vmem:[%s1657_s1 + $0x4c] sm:$0xf0] }
  0x19   : > { %v1228_v61 = vld [vmem:[%s1657_s1 + $0x44] sm:$0xf]  ;;  %v1023_v62 = vor.u32 %v1233_v54, %v1020_v55  ;;  %v996_v63 = vld [vmem:[%s1657_s1 + $0x50] sm:$0xf0]  ;;  %v1002_v0 = vld [vmem:[%s1657_s1 + $0x48] sm:$0xf]  ;;  %v995_v4 = vor.u32 %v1230_v60, %v994_v59 }
  0x1a   : > { %449 = vmatpush.bf16.msra.mxu0 %v1027_v44  ;;  %v1231_v1 = vld [vmem:[%s1657_s1 + $0x54] sm:$0xf0]  ;;  %v1229_v2 = vld [vmem:[%s1657_s1 + $0x4c] sm:$0xf]  ;;  %v1004_v3 = vld [vmem:[%s1657_s1 + $0x58] sm:$0xf0]  ;;  %v999_v6 = vor.u32 %v1228_v61, %v996_v63 }
  0x1b   : > { %468 = vmatpush.bf16.msra.mxu1 %v1031_v45  ;;  %487 = vmatpush.bf16.msra.mxu2 %v1035_v46  ;;  %v978_v5 = vld [vmem:[%s1657_s1 + $0x20] sm:$0xf]  ;;  %v1003_v7 = vor.u32 %v1231_v1, %v1002_v0  ;;  %v1226_v8 = vld [vmem:[%s1657_s1 + $0x2c] sm:$0xf0]  ;;  %v1224_v9 = vld [vmem:[%s1657_s1 + $0x24] sm:$0xf]  ;;  %v1007_v11 = vor.u32 %v1229_v2, %v1004_v3 }
  0x1c   : > { %506 = vmatpush.bf16.msra.mxu3 %v1039_v50  ;;  %v980_v10 = vld [vmem:[%s1657_s1 + $0x30] sm:$0xf0]  ;;  %v986_v12 = vld [vmem:[%s1657_s1 + $0x28] sm:$0xf]  ;;  %v1227_v13 = vld [vmem:[%s1657_s1 + $0x34] sm:$0xf0]  ;;  %v979_v16 = vor.u32 %v1226_v8, %v978_v5 }
  0x1d   : > { %v1225_v14 = vld [vmem:[%s1657_s1 + $0x2c] sm:$0xf]  ;;  %v988_v15 = vld [vmem:[%s1657_s1 + $0x38] sm:$0xf0]  ;;  %v962_v17 = vld [vmem:[%s1657_s1] sm:$0xf]  ;;  %v983_v19 = vor.u32 %v1224_v9, %v980_v10  ;;  %v987_v20 = vor.u32 %v1227_v13, %v986_v12 }
  0x1e   : > { %450 = vmatpush.bf16.msra.mxu0 %v1011_v56  ;;  %v1222_v18 = vld [vmem:[%s1657_s1 + $0xc] sm:$0xf0]  ;;  %v1220_v21 = vld [vmem:[%s1657_s1 + $0x4] sm:$0xf]  ;;  %v964_v22 = vld [vmem:[%s1657_s1 + $0x10] sm:$0xf0]  ;;  %v991_v23 = vor.u32 %v1225_v14, %v988_v15 }
  0x1f   : > { %469 = vmatpush.bf16.msra.mxu1 %v1015_v57  ;;  %488 = vmatpush.bf16.msra.mxu2 %v1019_v58  ;;  %s1663_s11 = smov (!%p217_p3, %s948_s11), 15  ;;  %v970_v24 = vld [vmem:[%s1657_s1 + $0x8] sm:$0xf]  ;;  %v1223_v25 = vld [vmem:[%s1657_s1 + $0x14] sm:$0xf0]  ;;  %v963_v28 = vor.u32 %v1222_v18, %v962_v17  ;;  %v967_v29 = vor.u32 %v1220_v21, %v964_v22  ;;  %v1258_v36 = vld [vmem:[%s1659_s3 + $0x30] sm:$0xff] }
  0x20   : > { %507 = vmatpush.bf16.msra.mxu3 %v1023_v62  ;;  %v1221_v26 = vld [vmem:[%s1657_s1 + $0xc] sm:$0xf]  ;;  %v972_v27 = vld [vmem:[%s1657_s1 + $0x18] sm:$0xf0]  ;;  %s949_s8 = sshll.u32 %s1663_s11, 2  ;;  %v971_v30 = vor.u32 %v1223_v25, %v970_v24  ;;  %v1266_v38 = vld [vmem:[%s1659_s3 + $0x70] sm:$0xff] }
  0x21   : > { %s1539_s12 = scalar_lea.vmem %s1656_s0, %s949_s8  ;;  %v975_v31 = vor.u32 %v1221_v26, %v972_v27  ;;  %v1259_v32 = vld [vmem:[%s1659_s3 + $0x38] sm:$0xff]  ;;  %v1274_v39 = vld [vmem:[%s1659_s3 + $0xb0] sm:$0xff]  ;;  %v1257_v40 = vld [vmem:[%s1659_s3 + $0x28] sm:$0xff]  ;;  %s951_s13 = sshll.u32 %s1663_s11, 3  ;;  %vm882_vm0 = vcmask 31744  }
  0x22   : > { %451 = vmatpush.bf16.msra.mxu0 %v995_v4  ;;  %v1218_v33 = vld [vmem:[%s1539_s12] sm:$0xff]  ;;  %v1267_v34 = vld [vmem:[%s1659_s3 + $0x78] sm:$0xff]  ;;  %v1282_v41 = vld [vmem:[%s1659_s3 + $0xf0] sm:$0xff]  ;;  %s226_s16 = scalar_lea.vmem %s1661_s5, %s951_s13 }
  0x23   : > { %470 = vmatpush.bf16.msra.mxu1 %v999_v6  ;;  %489 = vmatpush.bf16.msra.mxu2 %v1003_v7  ;;  %v1275_v35 = vld [vmem:[%s1659_s3 + $0xb8] sm:$0xff]  ;;  %v1265_v42 = vld [vmem:[%s1659_s3 + $0x68] sm:$0xff]  ;;  %v1256_v44 = vld [vmem:[%s1659_s3 + $0x20] sm:$0xff] }
  0x24   : > { %508 = vmatpush.bf16.msra.mxu3 %v1007_v11  ;;  %v1283_v37 = vld [vmem:[%s1659_s3 + $0xf8] sm:$0xff]  ;;  %v1273_v43 = vld [vmem:[%s1659_s3 + $0xa8] sm:$0xff]  ;;  %v1264_v46 = vld [vmem:[%s1659_s3 + $0x60] sm:$0xff] }
  0x25   : > { %v1281_v45 = vld [vmem:[%s1659_s3 + $0xe8] sm:$0xff]  ;;  %v1255_v48 = vld [vmem:[%s1659_s3 + $0x18] sm:$0xff]  ;;  %v1272_v50 = vld [vmem:[%s1659_s3 + $0xa0] sm:$0xff] }
  0x26   : > { %452 = vmatpush.bf16.msra.mxu0 %v979_v16  ;;  %v1219_v47 = vld [vmem:[%s1539_s12 + $0x8] sm:$0xff]  ;;  %v1263_v49 = vld [vmem:[%s1659_s3 + $0x58] sm:$0xff]  ;;  %v1280_v51 = vld [vmem:[%s1659_s3 + $0xe0] sm:$0xff] }
  0x27   : > { %471 = vmatpush.bf16.msra.mxu1 %v983_v19  ;;  %490 = vmatpush.bf16.msra.mxu2 %v987_v20  ;;  %v1254_v52 = vld [vmem:[%s1659_s3 + $0x10] sm:$0xff]  ;;  %v1271_v54 = vld [vmem:[%s1659_s3 + $0x98] sm:$0xff]  ;;  %v1253_v56 = vld [vmem:[%s1659_s3 + $0x8] sm:$0xff] }
  0x28   : > { %509 = vmatpush.bf16.msra.mxu3 %v991_v23  ;;  %v1262_v53 = vld [vmem:[%s1659_s3 + $0x50] sm:$0xff]  ;;  %v1279_v55 = vld [vmem:[%s1659_s3 + $0xd8] sm:$0xff]  ;;  %v1261_v57 = vld [vmem:[%s1659_s3 + $0x48] sm:$0xff] }
  0x29   : > { %v1270_v58 = vld [vmem:[%s1659_s3 + $0x90] sm:$0xff]  ;;  %v1252_v60 = vld [vmem:[%s1659_s3] sm:$0xff]  ;;  %v1269_v62 = vld [vmem:[%s1659_s3 + $0x88] sm:$0xff] }
  0x2a   : > { %453 = vmatpush.bf16.msra.mxu0 %v963_v28  ;;  %v1278_v59 = vld [vmem:[%s1659_s3 + $0xd0] sm:$0xff]  ;;  %v1260_v61 = vld [vmem:[%s1659_s3 + $0x40] sm:$0xff]  ;;  %v1277_v63 = vld [vmem:[%s1659_s3 + $0xc8] sm:$0xff] }
  0x2b   : > { %472 = vmatpush.bf16.msra.mxu1 %v967_v29  ;;  %491 = vmatpush.bf16.msra.mxu2 %v971_v30  ;;  %v1268_v0 = vld [vmem:[%s1659_s3 + $0x80] sm:$0xff] }
  0x2c   : > { %510 = vmatpush.bf16.msra.mxu3 %v975_v31  ;;  %v1276_v1 = vld [vmem:[%s1659_s3 + $0xc0] sm:$0xff] }
  0x2d   : > { %454 = vmatmul.bf16.vlgmr.msra.gmra.mxu0 %v1218_v33  ;;  %v264_v2 = vld [vmem:[%s1658_s2] sm:$0xf] }
  0x2e   : > { %806 = vmatpush.bf16.msrb.mxu0 %v1259_v32  ;;  %473 = vmatmul.bf16.vlgmr.msra.gmra.mxu1 %v1218_v33  ;;  %v266_v4 = vperm.slane %v264_v2, 0  ;;  %v267_v6 = vperm.slane %v264_v2, 1  ;;  %v268_v16 = vperm.slane %v264_v2, 2  ;;  %v269_v18 = vperm.slane %v264_v2, 3 }
  0x2f   : > { %825 = vmatpush.bf16.msrb.mxu1 %v1267_v34  ;;  %492 = vmatmul.bf16.vlgmr.msra.gmra.mxu2 %v1218_v33 }
  0x30   : > { %511 = vmatmul.bf16.vlgmr.msra.gmra.mxu3 %v1218_v33  ;;  %844 = vmatpush.bf16.msrb.mxu2 %v1275_v35 }
  0x31   : > { %863 = vmatpush.bf16.msrb.mxu3 %v1283_v37 }
  0x32   : > { %807 = vmatpush.bf16.msrb.mxu0 %v1258_v36 }
  0x33   : > { %826 = vmatpush.bf16.msrb.mxu1 %v1266_v38 }
  0x34   : > { %845 = vmatpush.bf16.msrb.mxu2 %v1274_v39 }
  0x35   : > { %864 = vmatpush.bf16.msrb.mxu3 %v1282_v41 }
  0x36   : > { %808 = vmatpush.bf16.msrb.mxu0 %v1257_v40 }
  0x37   : > { %827 = vmatpush.bf16.msrb.mxu1 %v1265_v42 }
  0x38   : > { %846 = vmatpush.bf16.msrb.mxu2 %v1273_v43 }
  0x39   : > { %865 = vmatpush.bf16.msrb.mxu3 %v1281_v45 }
  0x3a   : > { %809 = vmatpush.bf16.msrb.mxu0 %v1256_v44 }
  0x3b   : > { %828 = vmatpush.bf16.msrb.mxu1 %v1264_v46 }
  0x3c   : > { %847 = vmatpush.bf16.msrb.mxu2 %v1272_v50 }
  0x3d   : > { %459 = vmatmul.bf16.gmra.mxu0 %v1219_v47  ;;  %866 = vmatpush.bf16.msrb.mxu3 %v1280_v51 }
  0x3e   : > { %478 = vmatmul.bf16.gmra.mxu1 %v1219_v47  ;;  %810 = vmatpush.bf16.msrb.mxu0 %v1255_v48 }
  0x3f   : > { %497 = vmatmul.bf16.gmra.mxu2 %v1219_v47  ;;  %829 = vmatpush.bf16.msrb.mxu1 %v1263_v49 }
  0x40   : > { %516 = vmatmul.bf16.gmra.mxu3 %v1219_v47  ;;  %848 = vmatpush.bf16.msrb.mxu2 %v1271_v54 }
  0x41   : > { %867 = vmatpush.bf16.msrb.mxu3 %v1279_v55 }
  0x42   : > { %811 = vmatpush.bf16.msrb.mxu0 %v1254_v52 }
  0x43   : > { %830 = vmatpush.bf16.msrb.mxu1 %v1262_v53 }
  0x44   : > { %849 = vmatpush.bf16.msrb.mxu2 %v1270_v58 }
  0x45   : > { %868 = vmatpush.bf16.msrb.mxu3 %v1278_v59 }
  0x46   : > { %812 = vmatpush.bf16.msrb.mxu0 %v1253_v56 }
  0x47   : > { %831 = vmatpush.bf16.msrb.mxu1 %v1261_v57 }
  0x48   : > { %850 = vmatpush.bf16.msrb.mxu2 %v1269_v62 }
  0x49   : > { %869 = vmatpush.bf16.msrb.mxu3 %v1277_v63 }
  0x4a   : > { %813 = vmatpush.bf16.msrb.mxu0 %v1252_v60 }
  0x4b   : > { %832 = vmatpush.bf16.msrb.mxu1 %v1260_v61 }
  0x4c   : > { %851 = vmatpush.bf16.msrb.mxu2 %v1268_v0  ;;  %v1292_v0 = vld [vmem:[%s1660_s4] ss:$0 sm:$0xff] }
  0x4d   : > { %870 = vmatpush.bf16.msrb.mxu3 %v1276_v1 }
  0xaa   : > { %v455_v3 = vpop.f32.mrf.mxu0 }
  0xab   : > { %v474_v5 = vpop.f32.mrf.mxu1  ;;  %v456_v7 = vadd.f32 %v455_v3, %v266_v4 }
  0xac   : > { %v475_v8 = vadd.f32 %v474_v5, %v267_v6 }
  0xad   : > { %v522_v12 = vmax.f32 %v456_v7, 0.0 }
  0xae   : > { %v523_v15 = vmax.f32 %v475_v8, 0.0 }
  0xb2   : > { %v493_v9 = vpop.f32.mrf.mxu2  ;;  %v457_v11 = vpop.f32.mrf.mxu0 }
  0xb3   : > { %v512_v10 = vpop.f32.mrf.mxu3  ;;  %v458_v13 = vadd.f32 %v457_v11, %v266_v4  ;;  %v476_v14 = vpop.f32.mrf.mxu1  ;;  %v494_v22 = vadd.f32 %v493_v9, %v268_v16 }
  0xb4   : > { %v477_v17 = vadd.f32 %v476_v14, %v267_v6  ;;  %v513_v24 = vadd.f32 %v512_v10, %v269_v18 }
  0xb5   : > { %v526_v19 = vmax.f32 %v458_v13, 0.0  ;;  %v524_v31 = vmax.f32 %v494_v22, 0.0 }
  0xb6   : > { %v527_v20 = vmax.f32 %v477_v17, 0.0  ;;  %v525_v33 = vmax.f32 %v513_v24, 0.0 }
  0xb7   : > { %v538_v21 = vpack.c.bf16 %v526_v19, %v522_v12 }
  0xb8   : > { %v539_v23 = vpack.c.bf16 %v527_v20, %v523_v15 }
  0xb9   : > { %814 = vmatmul.bf16.vlgmr.msrb.gmra.mxu0 %v538_v21 }
  0xba   : > { %v495_v25 = vpop.f32.mrf.mxu2  ;;  %833 = vmatmul.bf16.vlgmr.msrb.gmra.mxu1 %v539_v23  ;;  %v460_v28 = vpop.f32.mrf.mxu0 }
  0xbb   : > { %v496_v26 = vadd.f32 %v495_v25, %v268_v16  ;;  %v514_v27 = vpop.f32.mrf.mxu3  ;;  %v479_v30 = vpop.f32.mrf.mxu1  ;;  %v461_v37 = vadd.f32 %v460_v28, %v266_v4 }
  0xbc   : > { %v515_v29 = vadd.f32 %v514_v27, %v269_v18  ;;  %v480_v38 = vadd.f32 %v479_v30, %v267_v6 }
  0xbd   : > { %v528_v32 = vmax.f32 %v496_v26, 0.0  ;;  %v530_v42 = vmax.f32 %v461_v37, 0.0 }
  0xbe   : > { %v529_v34 = vmax.f32 %v515_v29, 0.0  ;;  %v531_v45 = vmax.f32 %v480_v38, 0.0 }
  0xbf   : > { %v540_v35 = vpack.c.bf16 %v528_v32, %v524_v31 }
  0xc0   : > { %v541_v36 = vpack.c.bf16 %v529_v34, %v525_v33 }
  0xc1   : > { %852 = vmatmul.bf16.vlgmr.msrb.gmra.mxu2 %v540_v35 }
  0xc2   : > { %871 = vmatmul.bf16.vlgmr.msrb.gmra.mxu3 %v541_v36  ;;  %v498_v39 = vpop.f32.mrf.mxu2  ;;  %v462_v41 = vpop.f32.mrf.mxu0 }
  0xc3   : > { %v517_v40 = vpop.f32.mrf.mxu3  ;;  %v463_v43 = vadd.f32 %v462_v41, %v266_v4  ;;  %v481_v44 = vpop.f32.mrf.mxu1  ;;  %v499_v50 = vadd.f32 %v498_v39, %v268_v16 }
  0xc4   : > { %v482_v46 = vadd.f32 %v481_v44, %v267_v6  ;;  %v518_v52 = vadd.f32 %v517_v40, %v269_v18 }
  0xc5   : > { %v534_v47 = vmax.f32 %v463_v43, 0.0  ;;  %v532_v57 = vmax.f32 %v499_v50, 0.0 }
  0xc6   : > { %v535_v48 = vmax.f32 %v482_v46, 0.0  ;;  %v533_v59 = vmax.f32 %v518_v52, 0.0 }
  0xc7   : > { %v542_v49 = vpack.c.bf16 %v534_v47, %v530_v42 }
  0xc8   : > { %v543_v51 = vpack.c.bf16 %v535_v48, %v531_v45 }
  0xc9   : > { %819 = vmatmul.bf16.gmra.mxu0 %v542_v49 }
  0xca   : > { %v500_v53 = vpop.f32.mrf.mxu2  ;;  %838 = vmatmul.bf16.gmra.mxu1 %v543_v51 }
  0xcb   : > { %v501_v54 = vadd.f32 %v500_v53, %v268_v16  ;;  %v519_v55 = vpop.f32.mrf.mxu3 }
  0xcc   : > { %v520_v56 = vadd.f32 %v519_v55, %v269_v18 }
  0xcd   : > { %v536_v58 = vmax.f32 %v501_v54, 0.0 }
  0xce   : > { %v537_v60 = vmax.f32 %v520_v56, 0.0 }
  0xcf   : > { %v544_v61 = vpack.c.bf16 %v536_v58, %v532_v57 }
  0xd0   : > { %v545_v62 = vpack.c.bf16 %v537_v60, %v533_v59 }
  0xd1   : > { %857 = vmatmul.bf16.gmra.mxu2 %v544_v61 }
  0xd2   : > { %876 = vmatmul.bf16.gmra.mxu3 %v545_v62 }
 0x136   : > { %v815_v63 = vpop.f32.mrf.mxu0 }
 0x137   : > { %v834_v1 = vpop.f32.mrf.mxu1  ;;  %v816_v2 = vadd.f32 %v1292_v0, %v815_v63 }
 0x139   : > { %v835_v4 = vadd.f32 %v834_v1, %v816_v2 }
 0x13e   : > { %v817_v3 = vpop.f32.mrf.mxu0 }
 0x13f   : > { %v836_v8 = vpop.f32.mrf.mxu1  ;;  %v818_v9 = vadd.f32 %v1292_v0, %v817_v3 }
 0x141   : > { %v837_v12 = vadd.f32 %v836_v8, %v818_v9 }
 0x144   : > { %v853_v5 = vpop.f32.mrf.mxu2 }
 0x145   : > { %v854_v6 = vadd.f32 %v853_v5, %v835_v4  ;;  %v872_v7 = vpop.f32.mrf.mxu3 }
 0x146   : > { %v820_v11 = vpop.f32.mrf.mxu0 }
 0x147   : > { %v873_v10 = vadd.f32 %v872_v7, %v854_v6  ;;  %v821_v16 = vadd.f32 %v1292_v0, %v820_v11  ;;  %v839_v18 = vpop.f32.mrf.mxu1 }
 0x149   : > { %883 = vst.msk [vmem:[%s226_s16] sm:$0xff] %vm882_vm0, %v873_v10  ;;  %v840_v19 = vadd.f32 %v839_v18, %v821_v16 }
 0x14c   : > { %v855_v13 = vpop.f32.mrf.mxu2 }
 0x14d   : > { %v856_v14 = vadd.f32 %v855_v13, %v837_v12  ;;  %v874_v15 = vpop.f32.mrf.mxu3 }
 0x14e   : > { %v822_v20 = vpop.f32.mrf.mxu0 }
 0x14f   : > { %v875_v17 = vadd.f32 %v874_v15, %v856_v14  ;;  %v823_v24 = vadd.f32 %v1292_v0, %v822_v20  ;;  %v841_v26 = vpop.f32.mrf.mxu1 }
 0x151   : > { %884 = vst.msk [vmem:[%s226_s16 + $0x8] sm:$0xff] %vm882_vm0, %v875_v17  ;;  %v842_v27 = vadd.f32 %v841_v26, %v823_v24 }
 0x154   : > { %v858_v21 = vpop.f32.mrf.mxu2 }
 0x155   : > { %v859_v22 = vadd.f32 %v858_v21, %v840_v19  ;;  %v877_v23 = vpop.f32.mrf.mxu3 }
 0x157   : > { %v878_v25 = vadd.f32 %v877_v23, %v859_v22 }
 0x159   : > { %885 = vst.msk [vmem:[%s226_s16 + $0x10] sm:$0xff] %vm882_vm0, %v878_v25 }
 0x15c   : > { %v860_v28 = vpop.f32.mrf.mxu2 }
 0x15d   : > { %v861_v29 = vadd.f32 %v860_v28, %v842_v27  ;;  %v879_v30 = vpop.f32.mrf.mxu3 }
 0x15f   : > { %v880_v31 = vadd.f32 %v879_v30, %v861_v29 }
 0x161   : > { %886 = vst.msk [vmem:[%s226_s16 + $0x18] sm:$0xff] %vm882_vm0, %v880_v31 }
 0x162 PF: > { %s15_s18 = sadd.s32 1, %s1299_s18  }
 0x163   : > { %p12_p4 = scmp.ge.s32.totalorder %s15_s18, 6  }
 0x165   :  { %14 = sbr.rel (!%p12_p4) target bundleno = 1 (0x1), region = 70 }

</bundles_post_ra>
